<compile_context>
chip_gen: v7x
topology: tpu7x:2x2x1
jax: 0.10.0
libtpu: 0.0.40
codegen_flags: <defaults>
</compile_context>

<pallas_src>
import functools

import jax
import jax.numpy as jnp
import numpy as np
from jax.experimental import pallas as pl
from jax.experimental.pallas import tpu as pltpu

EPS = 1e-5  # nn.BatchNorm2d default eps


def _inverted_residual_kernel(x_ref, slab_ref, w3t_ref, bn3_ref, masks_ref, out_ref,
                              *, cin, W, inv_count, use_res, has_pad):
    j = pl.program_id(0)
    Ltot = out_ref.shape[1]

    slab = slab_ref[...]                       # (th, cin + 9 + 4)
    w1 = slab[:, 0:cin]                        # 1x1 expand rows        (th, cin)
    g1 = slab[:, cin + 9:cin + 10]
    b1 = slab[:, cin + 10:cin + 11]
    g2 = slab[:, cin + 11:cin + 12]
    b2 = slab[:, cin + 12:cin + 13]

    masks = masks_ref[...]                     # (6, Ltot): h-masks(-1,0,+1), w-masks(-1,0,+1)
    lane_valid = masks[1:2, :]                 # 1.0 on real lanes, 0.0 on pad lanes

    def bn(h, gamma, beta, relu6):
        # training-mode BatchNorm over the lane axis (N*H*W elements / channel);
        # pad lanes of h are kept at 0 so they do not perturb the sums.
        s = jnp.sum(h, axis=1, keepdims=True)
        ss = jnp.sum(h * h, axis=1, keepdims=True)
        mean = s * inv_count
        var = jnp.maximum(ss * inv_count - mean * mean, 0.0)
        scale = gamma * jax.lax.rsqrt(var + EPS)
        shift = beta - mean * scale
        y = h * scale + shift
        return jnp.clip(y, 0.0, 6.0) if relu6 else y

    x = x_ref[...]                             # (cin, Ltot), resident across grid steps

    # ---- stage 1: 1x1 expand conv (MXU) + BN + ReLU6 --------------------------
    h1 = jnp.dot(w1, x, preferred_element_type=jnp.float32)        # (th, Ltot)
    a1 = bn(h1, g1, b1, relu6=True)
    if has_pad:
        a1 = a1 * lane_valid                   # keep pad lanes at exactly 0

    # ---- stage 2: 3x3 depthwise conv (stride 1, zero pad 1) -------------------
    # Grouped form: 2 vertical rolls + 2 horizontal rolls (XLU) instead of 8;
    # edge / batch-boundary / pad validity is encoded in host-precomputed masks.
    def tap(k):                                # k = (dh+1)*3 + (dw+1), row-major taps
        return slab[:, cin + k:cin + k + 1]    # (th, 1)

    v_m = pltpu.roll(a1, shift=W, axis=1) * masks[0:1, :]          # a1[l - W], dh = -1
    v_p = pltpu.roll(a1, shift=Ltot - W, axis=1) * masks[2:3, :]   # a1[l + W], dh = +1

    u_m = v_m * tap(0) + a1 * tap(3) + v_p * tap(6)                # dw = -1 column
    u_0 = v_m * tap(1) + a1 * tap(4) + v_p * tap(7)                # dw =  0 column
    u_p = v_m * tap(2) + a1 * tap(5) + v_p * tap(8)                # dw = +1 column

    acc = (u_0
           + pltpu.roll(u_m, shift=1, axis=1) * masks[3:4, :]
           + pltpu.roll(u_p, shift=Ltot - 1, axis=1) * masks[5:6, :])

    a2 = bn(acc, g2, b2, relu6=True)
    if has_pad:
        a2 = a2 * lane_valid

    # ---- stage 3: 1x1 projection conv (MXU), accumulated over hidden blocks ---
    w3t = w3t_ref[0]                           # (oup, th)
    proj = jnp.dot(w3t, a2, preferred_element_type=jnp.float32)    # (oup, Ltot)

    @pl.when(j == 0)
    def _():
        out_ref[...] = proj

    @pl.when(j > 0)
    def _():
        out_ref[...] += proj

    # ---- finalize: BN3 over the fully accumulated projection (+ residual) -----
    @pl.when(j == pl.num_programs(0) - 1)
    def _():
        g3 = bn3_ref[:, 0:1]
        b3 = bn3_ref[:, 1:2]
        y = bn(out_ref[...], g3, b3, relu6=False)   # pad lanes discarded by wrapper
        if use_res:
            y = y + x
        out_ref[...] = y


def _vmem_limit_bytes():
    cap = 64 * 1024 * 1024                     # safe default (v7x physical VMEM)
    try:
        info = pltpu.get_tpu_info()
        cap = int(getattr(info, "vmem_capacity_bytes", cap)) or cap
    except Exception:
        pass
    return (cap * 3) // 4                      # ~96 MiB on v5e/v6e, ~48 MiB on v7x


def _pick_tile_hidden(hidden, cin, oup, Ltot, budget_bytes):
    """Largest hidden-channel block whose working set fits the VMEM budget."""
    fixed = 4 * Ltot * (cin + oup + 6) + 4 * oup * 2

    def fits(th):
        weights = 4 * 2 * (th * (cin + 13) + oup * th)   # double-buffered param blocks
        live = 4 * 8 * th * Ltot                         # a1 / v / u / acc / a2 headroom
        return fixed + weights + live <= budget_bytes

    if fits(hidden):
        return hidden
    cands = [d for d in range(8, hidden, 8) if hidden % d == 0]
    for th in sorted(cands, reverse=True):
        if fits(th):
            return th
    return min(cands) if cands else hidden


def inverted_residual(x_nchw, params, *, stride, use_res, tile_hidden=None):
    """NCHW in, NCHW out."""
    assert stride == 1  # TODO(synk): stride == 2 depthwise subsampling not implemented.
    w1, g1, b1, wdw, g2, b2, w3, g3, b3 = params
    x = x_nchw.astype(jnp.float32)
    N, cin, H, W = x.shape
    hidden, oup = w3.shape
    if use_res:
        assert cin == oup

    NL = N * H * W
    Ltot = ((NL + 127) // 128) * 128           # lane-dense last dim (multiple of 128)
    has_pad = Ltot != NL

    # NCHW -> (C, N*H*W): one boundary relayout; every stage is then 2-D.
    x_cn = jnp.transpose(x, (1, 0, 2, 3)).reshape(cin, NL)
    if has_pad:
        x_cn = jnp.pad(x_cn, ((0, 0), (0, Ltot - NL)))

    # Host-precomputed depthwise edge/pad masks (hoists iota/div/compare chain).
    lane = np.arange(Ltot)
    p = lane % (H * W)
    valid = lane < NL
    h_idx, w_idx = p // W, p % W
    hm = np.stack([(h_idx >= 1) & valid, valid, (h_idx <= H - 2) & valid], 0)
    wm = np.stack([(w_idx >= 1) & valid, valid, (w_idx <= W - 2) & valid], 0)
    masks = jnp.asarray(np.concatenate([hm, wm], 0).astype(np.float32))   # (6, Ltot)

    # Packed per-hidden-channel parameter slab: [w1 | 3x3 taps | g1 b1 g2 b2].
    slab = jnp.concatenate([w1, wdw, g1, b1, g2, b2], axis=1)             # (hidden, cin+13)
    bn3 = jnp.concatenate([g3, b3], axis=1)                               # (oup, 2)

    vmem_limit = _vmem_limit_bytes()
    if tile_hidden is None:
        tile_hidden = _pick_tile_hidden(hidden, cin, oup, Ltot, (vmem_limit * 4) // 5)
    assert hidden % tile_hidden == 0
    assert tile_hidden == hidden or tile_hidden % 8 == 0
    n_blk = hidden // tile_hidden

    # w3 pre-transposed + blocked on host: (n_blk, oup, tile_hidden).
    w3t = jnp.transpose(w3.reshape(n_blk, tile_hidden, oup), (0, 2, 1))

    kernel = functools.partial(_inverted_residual_kernel, cin=cin, W=W,
                               inv_count=1.0 / float(NL), use_res=use_res,
                               has_pad=has_pad)

    grid_spec = pltpu.PrefetchScalarGridSpec(
        num_scalar_prefetch=0,
        grid=(n_blk,),
        in_specs=[
            pl.BlockSpec((cin, Ltot), lambda j: (0, 0)),                  # x (fetched once)
            pl.BlockSpec((tile_hidden, cin + 13), lambda j: (j, 0)),      # packed param slab
            pl.BlockSpec((1, oup, tile_hidden), lambda j: (j, 0, 0)),     # w3^T block
            pl.BlockSpec((oup, 2), lambda j: (0, 0)),                     # [g3 | b3]
            pl.BlockSpec((6, Ltot), lambda j: (0, 0)),                    # edge/pad masks
        ],
        out_specs=pl.BlockSpec((oup, Ltot), lambda j: (0, 0)),            # resident accumulator
    )

    out = pl.pallas_call(
        kernel,
        out_shape=jax.ShapeDtypeStruct((oup, Ltot), jnp.float32),
        grid_spec=grid_spec,
        compiler_params=pltpu.CompilerParams(
            dimension_semantics=("arbitrary",),        # hidden-block axis is a reduction
            vmem_limit_bytes=int(vmem_limit),
        ),
    )(x_cn, slab, w3t, bn3, masks)

    out = out[:, :NL].reshape(oup, N, H, W)
    return jnp.transpose(out, (1, 0, 2, 3))


def ref_forward(x_nchw, params, *, use_res):
    """Pure-JAX reference (lax conv, NHWC internally) for validation."""
    w1, g1, b1, wdw, g2, b2, w3, g3, b3 = params
    hidden = w1.shape[0]
    x = jnp.transpose(x_nchw, (0, 2, 3, 1)).astype(jnp.float32)
    dn = ('NHWC', 'HWIO', 'NHWC')

    def bn4(h, g, b, relu6):
        mean = jnp.mean(h, axis=(0, 1, 2), keepdims=True)
        var = jnp.mean((h - mean) ** 2, axis=(0, 1, 2), keepdims=True)
        y = (h - mean) * jax.lax.rsqrt(var + EPS) * g.reshape(1, 1, 1, -1) + b.reshape(1, 1, 1, -1)
        return jnp.clip(y, 0.0, 6.0) if relu6 else y

    k1 = jnp.transpose(w1, (1, 0)).reshape(1, 1, w1.shape[1], hidden)
    h = jax.lax.conv_general_dilated(x, k1, (1, 1), 'VALID', dimension_numbers=dn)
    h = bn4(h, g1, b1, True)
    kdw = jnp.transpose(wdw, (1, 0)).reshape(3, 3, 1, hidden)
    h = jax.lax.conv_general_dilated(h, kdw, (1, 1), 'SAME', dimension_numbers=dn,
                                     feature_group_count=hidden)
    h = bn4(h, g2, b2, True)
    k3 = w3.reshape(1, 1, hidden, w3.shape[1])
    h = jax.lax.conv_general_dilated(h, k3, (1, 1), 'VALID', dimension_numbers=dn)
    h = bn4(h, g3, b3, False)
    if use_res:
        h = h + x
    return jnp.transpose(h, (0, 3, 1, 2))


def make_params(key, inp, oup, expand_ratio):
    hidden = round(inp * expand_ratio)
    ks = jax.random.split(key, 9)
    w1 = 0.1 * jax.random.normal(ks[0], (hidden, inp), jnp.float32)    # 1x1 expand [out,in]
    g1 = 1.0 + 0.1 * jax.random.normal(ks[1], (hidden, 1), jnp.float32)
    b1 = 0.1 * jax.random.normal(ks[2], (hidden, 1), jnp.float32)
    wdw = 0.1 * jax.random.normal(ks[3], (hidden, 9), jnp.float32)     # depthwise [c, kh*3+kw]
    g2 = 1.0 + 0.1 * jax.random.normal(ks[4], (hidden, 1), jnp.float32)
    b2 = 0.1 * jax.random.normal(ks[5], (hidden, 1), jnp.float32)
    w3 = 0.1 * jax.random.normal(ks[6], (hidden, oup), jnp.float32)    # 1x1 project [in,out]
    g3 = 1.0 + 0.1 * jax.random.normal(ks[7], (oup, 1), jnp.float32)
    b3 = 0.1 * jax.random.normal(ks[8], (oup, 1), jnp.float32)
    return (w1, g1, b1, wdw, g2, b2, w3, g3, b3)


if __name__ == "__main__":
    # InvertedResidual(inp=8, oup=8, stride=1, expand_ratio=4) -> hidden=32, residual on.
    inp, oup, stride, expand_ratio = 8, 8, 1, 4
    use_res = (stride == 1 and inp == oup)
    # 14x14 feature map: N*H*W = 392 is NOT a multiple of 128, exercising the
    # lane-padding + pad-masking path that keeps the output store lane-dense.
    N, H, W = 2, 14, 14

    key = jax.random.PRNGKey(0)
    kx, kp = jax.random.split(key)
    x = jax.random.normal(kx, (N, inp, H, W), jnp.float32)   # NCHW like PyTorch
    params = make_params(kp, inp, oup, expand_ratio)

    # tile_hidden=16 -> grid of 2 hidden-channel blocks (exercises the accumulate path).
    out = inverted_residual(x, params, stride=stride, use_res=use_res, tile_hidden=16)
    out = jax.block_until_ready(out)

    ref = jax.block_until_ready(ref_forward(x, params, use_res=use_res))
    np.testing.assert_allclose(np.asarray(out), np.asarray(ref), rtol=2e-3, atol=2e-3)

    print("KERNEL_OK")
</pallas_src>

<mosaic_0001>
module attributes {stable_mosaic.version = 11 : i64} {
  func.func @_inverted_residual_kernel(%arg0: i32, %arg1: memref<8x512xf32, #tpu.memory_space<vmem>>, %arg2: memref<16x21xf32, #tpu.memory_space<vmem>>, %arg3: memref<1x8x16xf32, #tpu.memory_space<vmem>>, %arg4: memref<8x2xf32, #tpu.memory_space<vmem>>, %arg5: memref<6x512xf32, #tpu.memory_space<vmem>>, %arg6: memref<8x512xf32, #tpu.memory_space<vmem>>) attributes {dimension_semantics = [#tpu.dimension_semantics<arbitrary>], iteration_bounds = array<i64: 2>, scalar_prefetch = 0 : i64, scratch_operands = 0 : i64, tpu.core_type = #tpu.core_type<tc>, window_params = [{pipeline_mode = #tpu.pipeline_mode<synchronous>, transform_indices = @transform_0, window_bounds = array<i64: 8, 512>}, {transform_indices = @transform_1, window_bounds = array<i64: 16, 21>}, {transform_indices = @transform_2, window_bounds = array<i64: 1, 8, 16>}, {pipeline_mode = #tpu.pipeline_mode<synchronous>, transform_indices = @transform_3, window_bounds = array<i64: 8, 2>}, {pipeline_mode = #tpu.pipeline_mode<synchronous>, transform_indices = @transform_4, window_bounds = array<i64: 6, 512>}, {pipeline_mode = #tpu.pipeline_mode<synchronous>, transform_indices = @transform_5, window_bounds = array<i64: 8, 512>}]} {
    %c0 = arith.constant 0 : index
    %c0_0 = arith.constant 0 : index
    %0 = vector.load %arg2[%c0, %c0_0] : memref<16x21xf32, #tpu.memory_space<vmem>>, vector<16x21xf32>
    %1 = vector.extract_strided_slice %0 {offsets = [0, 0], sizes = [16, 8], strides = [1, 1]} : vector<16x21xf32> to vector<16x8xf32>
    %2 = vector.extract_strided_slice %0 {offsets = [0, 17], sizes = [16, 1], strides = [1, 1]} : vector<16x21xf32> to vector<16x1xf32>
    %3 = vector.extract_strided_slice %0 {offsets = [0, 18], sizes = [16, 1], strides = [1, 1]} : vector<16x21xf32> to vector<16x1xf32>
    %4 = vector.extract_strided_slice %0 {offsets = [0, 19], sizes = [16, 1], strides = [1, 1]} : vector<16x21xf32> to vector<16x1xf32>
    %5 = vector.extract_strided_slice %0 {offsets = [0, 20], sizes = [16, 1], strides = [1, 1]} : vector<16x21xf32> to vector<16x1xf32>
    %c0_1 = arith.constant 0 : index
    %c0_2 = arith.constant 0 : index
    %6 = vector.load %arg5[%c0_1, %c0_2] : memref<6x512xf32, #tpu.memory_space<vmem>>, vector<6x512xf32>
    %7 = vector.extract_strided_slice %6 {offsets = [1, 0], sizes = [1, 512], strides = [1, 1]} : vector<6x512xf32> to vector<1x512xf32>
    %c0_3 = arith.constant 0 : index
    %c0_4 = arith.constant 0 : index
    %8 = vector.load %arg1[%c0_3, %c0_4] : memref<8x512xf32, #tpu.memory_space<vmem>>, vector<8x512xf32>
    %cst = arith.constant dense<0.000000e+00> : vector<16x512xf32>
    %9 = tpu.matmul %1, %8, %cst {dimension_numbers = #tpu.dot_dimension_numbers<[1], [0], [0], [1], [0, 0, 1, 1], [], []>} : vector<16x8xf32>, vector<8x512xf32>, vector<16x512xf32> -> vector<16x512xf32>
    %cst_5 = arith.constant dense<0.000000e+00> : vector<16xf32>
    %10 = vector.multi_reduction <add>, %9, %cst_5 [1] : vector<16x512xf32> to vector<16xf32>
    %11 = vector.shape_cast %10 : vector<16xf32> to vector<16x1xf32>
    %12 = arith.mulf %9, %9 : vector<16x512xf32>
    %cst_6 = arith.constant dense<0.000000e+00> : vector<16xf32>
    %13 = vector.multi_reduction <add>, %12, %cst_6 [1] : vector<16x512xf32> to vector<16xf32>
    %14 = vector.shape_cast %13 : vector<16xf32> to vector<16x1xf32>
    %cst_7 = arith.constant 0.00255102036 : f32
    %15 = vector.broadcast %cst_7 : f32 to vector<16x1xf32>
    %16 = arith.mulf %11, %15 : vector<16x1xf32>
    %cst_8 = arith.constant 0.00255102036 : f32
    %17 = vector.broadcast %cst_8 : f32 to vector<16x1xf32>
    %18 = arith.mulf %14, %17 : vector<16x1xf32>
    %19 = arith.mulf %16, %16 : vector<16x1xf32>
    %20 = arith.subf %18, %19 : vector<16x1xf32>
    %cst_9 = arith.constant 0.000000e+00 : f32
    %21 = vector.broadcast %cst_9 : f32 to vector<16x1xf32>
    %22 = arith.maximumf %20, %21 : vector<16x1xf32>
    %cst_10 = arith.constant 9.99999974E-6 : f32
    %23 = vector.broadcast %cst_10 : f32 to vector<16x1xf32>
    %24 = arith.addf %22, %23 : vector<16x1xf32>
    %25 = math.rsqrt %24 : vector<16x1xf32>
    %26 = arith.mulf %2, %25 : vector<16x1xf32>
    %27 = arith.mulf %16, %26 : vector<16x1xf32>
    %28 = arith.subf %3, %27 : vector<16x1xf32>
    %29 = vector.broadcast %26 : vector<16x1xf32> to vector<16x512xf32>
    %30 = arith.mulf %9, %29 : vector<16x512xf32>
    %31 = vector.broadcast %28 : vector<16x1xf32> to vector<16x512xf32>
    %32 = arith.addf %30, %31 : vector<16x512xf32>
    %cst_11 = arith.constant 0.000000e+00 : f32
    %cst_12 = arith.constant 6.000000e+00 : f32
    %33 = vector.broadcast %cst_11 : f32 to vector<16x512xf32>
    %34 = arith.maximumf %33, %32 : vector<16x512xf32>
    %35 = vector.broadcast %cst_12 : f32 to vector<16x512xf32>
    %36 = arith.minimumf %35, %34 : vector<16x512xf32>
    %37 = vector.broadcast %7 : vector<1x512xf32> to vector<16x512xf32>
    %38 = arith.mulf %36, %37 : vector<16x512xf32>
    %c14_i32 = arith.constant 14 : i32
    %39 = tpu.dynamic_rotate %38 by %c14_i32 dim 1 : vector<16x512xf32>, i32 -> vector<16x512xf32>
    %40 = vector.extract_strided_slice %6 {offsets = [0, 0], sizes = [1, 512], strides = [1, 1]} : vector<6x512xf32> to vector<1x512xf32>
    %41 = vector.broadcast %40 : vector<1x512xf32> to vector<16x512xf32>
    %42 = arith.mulf %39, %41 : vector<16x512xf32>
    %c498_i32 = arith.constant 498 : i32
    %43 = tpu.dynamic_rotate %38 by %c498_i32 dim 1 : vector<16x512xf32>, i32 -> vector<16x512xf32>
    %44 = vector.extract_strided_slice %6 {offsets = [2, 0], sizes = [1, 512], strides = [1, 1]} : vector<6x512xf32> to vector<1x512xf32>
    %45 = vector.broadcast %44 : vector<1x512xf32> to vector<16x512xf32>
    %46 = arith.mulf %43, %45 : vector<16x512xf32>
    %47 = vector.extract_strided_slice %0 {offsets = [0, 8], sizes = [16, 1], strides = [1, 1]} : vector<16x21xf32> to vector<16x1xf32>
    %48 = vector.broadcast %47 : vector<16x1xf32> to vector<16x512xf32>
    %49 = arith.mulf %42, %48 : vector<16x512xf32>
    %50 = vector.extract_strided_slice %0 {offsets = [0, 11], sizes = [16, 1], strides = [1, 1]} : vector<16x21xf32> to vector<16x1xf32>
    %51 = vector.broadcast %50 : vector<16x1xf32> to vector<16x512xf32>
    %52 = arith.mulf %38, %51 : vector<16x512xf32>
    %53 = arith.addf %49, %52 : vector<16x512xf32>
    %54 = vector.extract_strided_slice %0 {offsets = [0, 14], sizes = [16, 1], strides = [1, 1]} : vector<16x21xf32> to vector<16x1xf32>
    %55 = vector.broadcast %54 : vector<16x1xf32> to vector<16x512xf32>
    %56 = arith.mulf %46, %55 : vector<16x512xf32>
    %57 = arith.addf %53, %56 : vector<16x512xf32>
    %58 = vector.extract_strided_slice %0 {offsets = [0, 9], sizes = [16, 1], strides = [1, 1]} : vector<16x21xf32> to vector<16x1xf32>
    %59 = vector.broadcast %58 : vector<16x1xf32> to vector<16x512xf32>
    %60 = arith.mulf %42, %59 : vector<16x512xf32>
    %61 = vector.extract_strided_slice %0 {offsets = [0, 12], sizes = [16, 1], strides = [1, 1]} : vector<16x21xf32> to vector<16x1xf32>
    %62 = vector.broadcast %61 : vector<16x1xf32> to vector<16x512xf32>
    %63 = arith.mulf %38, %62 : vector<16x512xf32>
    %64 = arith.addf %60, %63 : vector<16x512xf32>
    %65 = vector.extract_strided_slice %0 {offsets = [0, 15], sizes = [16, 1], strides = [1, 1]} : vector<16x21xf32> to vector<16x1xf32>
    %66 = vector.broadcast %65 : vector<16x1xf32> to vector<16x512xf32>
    %67 = arith.mulf %46, %66 : vector<16x512xf32>
    %68 = arith.addf %64, %67 : vector<16x512xf32>
    %69 = vector.extract_strided_slice %0 {offsets = [0, 10], sizes = [16, 1], strides = [1, 1]} : vector<16x21xf32> to vector<16x1xf32>
    %70 = vector.broadcast %69 : vector<16x1xf32> to vector<16x512xf32>
    %71 = arith.mulf %42, %70 : vector<16x512xf32>
    %72 = vector.extract_strided_slice %0 {offsets = [0, 13], sizes = [16, 1], strides = [1, 1]} : vector<16x21xf32> to vector<16x1xf32>
    %73 = vector.broadcast %72 : vector<16x1xf32> to vector<16x512xf32>
    %74 = arith.mulf %38, %73 : vector<16x512xf32>
    %75 = arith.addf %71, %74 : vector<16x512xf32>
    %76 = vector.extract_strided_slice %0 {offsets = [0, 16], sizes = [16, 1], strides = [1, 1]} : vector<16x21xf32> to vector<16x1xf32>
    %77 = vector.broadcast %76 : vector<16x1xf32> to vector<16x512xf32>
    %78 = arith.mulf %46, %77 : vector<16x512xf32>
    %79 = arith.addf %75, %78 : vector<16x512xf32>
    %c1_i32 = arith.constant 1 : i32
    %80 = tpu.dynamic_rotate %57 by %c1_i32 dim 1 : vector<16x512xf32>, i32 -> vector<16x512xf32>
    %81 = vector.extract_strided_slice %6 {offsets = [3, 0], sizes = [1, 512], strides = [1, 1]} : vector<6x512xf32> to vector<1x512xf32>
    %82 = vector.broadcast %81 : vector<1x512xf32> to vector<16x512xf32>
    %83 = arith.mulf %80, %82 : vector<16x512xf32>
    %84 = arith.addf %68, %83 : vector<16x512xf32>
    %c511_i32 = arith.constant 511 : i32
    %85 = tpu.dynamic_rotate %79 by %c511_i32 dim 1 : vector<16x512xf32>, i32 -> vector<16x512xf32>
    %86 = vector.extract_strided_slice %6 {offsets = [5, 0], sizes = [1, 512], strides = [1, 1]} : vector<6x512xf32> to vector<1x512xf32>
    %87 = vector.broadcast %86 : vector<1x512xf32> to vector<16x512xf32>
    %88 = arith.mulf %85, %87 : vector<16x512xf32>
    %89 = arith.addf %84, %88 : vector<16x512xf32>
    %cst_13 = arith.constant dense<0.000000e+00> : vector<16xf32>
    %90 = vector.multi_reduction <add>, %89, %cst_13 [1] : vector<16x512xf32> to vector<16xf32>
    %91 = vector.shape_cast %90 : vector<16xf32> to vector<16x1xf32>
    %92 = arith.mulf %89, %89 : vector<16x512xf32>
    %cst_14 = arith.constant dense<0.000000e+00> : vector<16xf32>
    %93 = vector.multi_reduction <add>, %92, %cst_14 [1] : vector<16x512xf32> to vector<16xf32>
    %94 = vector.shape_cast %93 : vector<16xf32> to vector<16x1xf32>
    %cst_15 = arith.constant 0.00255102036 : f32
    %95 = vector.broadcast %cst_15 : f32 to vector<16x1xf32>
    %96 = arith.mulf %91, %95 : vector<16x1xf32>
    %cst_16 = arith.constant 0.00255102036 : f32
    %97 = vector.broadcast %cst_16 : f32 to vector<16x1xf32>
    %98 = arith.mulf %94, %97 : vector<16x1xf32>
    %99 = arith.mulf %96, %96 : vector<16x1xf32>
    %100 = arith.subf %98, %99 : vector<16x1xf32>
    %cst_17 = arith.constant 0.000000e+00 : f32
    %101 = vector.broadcast %cst_17 : f32 to vector<16x1xf32>
    %102 = arith.maximumf %100, %101 : vector<16x1xf32>
    %cst_18 = arith.constant 9.99999974E-6 : f32
    %103 = vector.broadcast %cst_18 : f32 to vector<16x1xf32>
    %104 = arith.addf %102, %103 : vector<16x1xf32>
    %105 = math.rsqrt %104 : vector<16x1xf32>
    %106 = arith.mulf %4, %105 : vector<16x1xf32>
    %107 = arith.mulf %96, %106 : vector<16x1xf32>
    %108 = arith.subf %5, %107 : vector<16x1xf32>
    %109 = vector.broadcast %106 : vector<16x1xf32> to vector<16x512xf32>
    %110 = arith.mulf %89, %109 : vector<16x512xf32>
    %111 = vector.broadcast %108 : vector<16x1xf32> to vector<16x512xf32>
    %112 = arith.addf %110, %111 : vector<16x512xf32>
    %cst_19 = arith.constant 0.000000e+00 : f32
    %cst_20 = arith.constant 6.000000e+00 : f32
    %113 = vector.broadcast %cst_19 : f32 to vector<16x512xf32>
    %114 = arith.maximumf %113, %112 : vector<16x512xf32>
    %115 = vector.broadcast %cst_20 : f32 to vector<16x512xf32>
    %116 = arith.minimumf %115, %114 : vector<16x512xf32>
    %117 = vector.broadcast %7 : vector<1x512xf32> to vector<16x512xf32>
    %118 = arith.mulf %116, %117 : vector<16x512xf32>
    %c0_21 = arith.constant 0 : index
    %c0_22 = arith.constant 0 : index
    %c0_23 = arith.constant 0 : index
    %119 = vector.load %arg3[%c0_21, %c0_22, %c0_23] : memref<1x8x16xf32, #tpu.memory_space<vmem>>, vector<1x8x16xf32>
    %120 = vector.shape_cast %119 : vector<1x8x16xf32> to vector<8x16xf32>
    %cst_24 = arith.constant dense<0.000000e+00> : vector<8x512xf32>
    %121 = tpu.matmul %120, %118, %cst_24 {dimension_numbers = #tpu.dot_dimension_numbers<[1], [0], [0], [1], [0, 0, 1, 1], [], []>} : vector<8x16xf32>, vector<16x512xf32>, vector<8x512xf32> -> vector<8x512xf32>
    %c0_i32 = arith.constant 0 : i32
    %122 = arith.cmpi eq, %arg0, %c0_i32 : i32
    %123 = arith.extui %122 : i1 to i32
    %c0_i32_25 = arith.constant 0 : i32
    %124 = arith.cmpi ne, %123, %c0_i32_25 : i32
    scf.if %124 {
      %c0_30 = arith.constant 0 : index
      %c0_31 = arith.constant 0 : index
      %131 = vector.load %arg6[%c0_30, %c0_31] : memref<8x512xf32, #tpu.memory_space<vmem>>, vector<8x512xf32>
      tpu.vector_store %arg6[%c0_30, %c0_31], %121 {strides = array<i32>} : memref<8x512xf32, #tpu.memory_space<vmem>>, vector<8x512xf32>,
    } else {
    }
    %c0_i32_26 = arith.constant 0 : i32
    %125 = arith.cmpi sgt, %arg0, %c0_i32_26 : i32
    %126 = arith.extui %125 : i1 to i32
    %c0_i32_27 = arith.constant 0 : i32
    %127 = arith.cmpi ne, %126, %c0_i32_27 : i32
    scf.if %127 {
      %c0_30 = arith.constant 0 : index
      %c0_31 = arith.constant 0 : index
      %131 = vector.load %arg6[%c0_30, %c0_31] : memref<8x512xf32, #tpu.memory_space<vmem>>, vector<8x512xf32>
      %132 = arith.addf %131, %121 : vector<8x512xf32>
      %c0_32 = arith.constant 0 : index
      %c0_33 = arith.constant 0 : index
      %133 = vector.load %arg6[%c0_32, %c0_33] : memref<8x512xf32, #tpu.memory_space<vmem>>, vector<8x512xf32>
      tpu.vector_store %arg6[%c0_32, %c0_33], %132 {strides = array<i32>} : memref<8x512xf32, #tpu.memory_space<vmem>>, vector<8x512xf32>,
    } else {
    }
    %c1_i32_28 = arith.constant 1 : i32
    %128 = arith.cmpi eq, %arg0, %c1_i32_28 : i32
    %129 = arith.extui %128 : i1 to i32
    %c0_i32_29 = arith.constant 0 : i32
    %130 = arith.cmpi ne, %129, %c0_i32_29 : i32
    scf.if %130 {
      %c0_30 = arith.constant 0 : index
      %c0_31 = arith.constant 0 : index
      %131 = vector.load %arg4[%c0_30, %c0_31] : memref<8x2xf32, #tpu.memory_space<vmem>>, vector<8x1xf32>
      %c0_32 = arith.constant 0 : index
      %c1 = arith.constant 1 : index
      %132 = vector.load %arg4[%c0_32, %c1] : memref<8x2xf32, #tpu.memory_space<vmem>>, vector<8x1xf32>
      %c0_33 = arith.constant 0 : index
      %c0_34 = arith.constant 0 : index
      %133 = vector.load %arg6[%c0_33, %c0_34] : memref<8x512xf32, #tpu.memory_space<vmem>>, vector<8x512xf32>
      %cst_35 = arith.constant dense<0.000000e+00> : vector<8xf32>
      %134 = vector.multi_reduction <add>, %133, %cst_35 [1] : vector<8x512xf32> to vector<8xf32>
      %135 = vector.shape_cast %134 : vector<8xf32> to vector<8x1xf32>
      %136 = arith.mulf %133, %133 : vector<8x512xf32>
      %cst_36 = arith.constant dense<0.000000e+00> : vector<8xf32>
      %137 = vector.multi_reduction <add>, %136, %cst_36 [1] : vector<8x512xf32> to vector<8xf32>
      %138 = vector.shape_cast %137 : vector<8xf32> to vector<8x1xf32>
      %cst_37 = arith.constant 0.00255102036 : f32
      %139 = vector.broadcast %cst_37 : f32 to vector<8x1xf32>
      %140 = arith.mulf %135, %139 : vector<8x1xf32>
      %cst_38 = arith.constant 0.00255102036 : f32
      %141 = vector.broadcast %cst_38 : f32 to vector<8x1xf32>
      %142 = arith.mulf %138, %141 : vector<8x1xf32>
      %143 = arith.mulf %140, %140 : vector<8x1xf32>
      %144 = arith.subf %142, %143 : vector<8x1xf32>
      %cst_39 = arith.constant 0.000000e+00 : f32
      %145 = vector.broadcast %cst_39 : f32 to vector<8x1xf32>
      %146 = arith.maximumf %144, %145 : vector<8x1xf32>
      %cst_40 = arith.constant 9.99999974E-6 : f32
      %147 = vector.broadcast %cst_40 : f32 to vector<8x1xf32>
      %148 = arith.addf %146, %147 : vector<8x1xf32>
      %149 = math.rsqrt %148 : vector<8x1xf32>
      %150 = arith.mulf %131, %149 : vector<8x1xf32>
      %151 = arith.mulf %140, %150 : vector<8x1xf32>
      %152 = arith.subf %132, %151 : vector<8x1xf32>
      %153 = vector.broadcast %150 : vector<8x1xf32> to vector<8x512xf32>
      %154 = arith.mulf %133, %153 : vector<8x512xf32>
      %155 = vector.broadcast %152 : vector<8x1xf32> to vector<8x512xf32>
      %156 = arith.addf %154, %155 : vector<8x512xf32>
      %157 = arith.addf %156, %8 : vector<8x512xf32>
      %c0_41 = arith.constant 0 : index
      %c0_42 = arith.constant 0 : index
      %158 = vector.load %arg6[%c0_41, %c0_42] : memref<8x512xf32, #tpu.memory_space<vmem>>, vector<8x512xf32>
      tpu.vector_store %arg6[%c0_41, %c0_42], %157 {strides = array<i32>} : memref<8x512xf32, #tpu.memory_space<vmem>>, vector<8x512xf32>,
    } else {
    }
    return
  }
  func.func @transform_0(%arg0: i32) -> (i32, i32) {
    %c0_i32 = arith.constant 0 : i32
    %c0_i32_0 = arith.constant 0 : i32
    %c0_i32_1 = arith.constant 0 : i32
    return %c0_i32, %c0_i32_0 : i32, i32
  }
  func.func @transform_1(%arg0: i32) -> (i32, i32) {
    %c0_i32 = arith.constant 0 : i32
    %c0_i32_0 = arith.constant 0 : i32
    return %arg0, %c0_i32 : i32, i32
  }
  func.func @transform_2(%arg0: i32) -> (i32, i32, i32) {
    %c0_i32 = arith.constant 0 : i32
    %c0_i32_0 = arith.constant 0 : i32
    %c0_i32_1 = arith.constant 0 : i32
    return %arg0, %c0_i32, %c0_i32_0 : i32, i32, i32
  }
  func.func @transform_3(%arg0: i32) -> (i32, i32) {
    %c0_i32 = arith.constant 0 : i32
    %c0_i32_0 = arith.constant 0 : i32
    %c0_i32_1 = arith.constant 0 : i32
    return %c0_i32, %c0_i32_0 : i32, i32
  }
  func.func @transform_4(%arg0: i32) -> (i32, i32) {
    %c0_i32 = arith.constant 0 : i32
    %c0_i32_0 = arith.constant 0 : i32
    %c0_i32_1 = arith.constant 0 : i32
    return %c0_i32, %c0_i32_0 : i32, i32
  }
  func.func @transform_5(%arg0: i32) -> (i32, i32) {
    %c0_i32 = arith.constant 0 : i32
    %c0_i32_0 = arith.constant 0 : i32
    %c0_i32_1 = arith.constant 0 : i32
    return %c0_i32, %c0_i32_0 : i32, i32
  }
}

</mosaic_0001>

<bundles_post_ra>
// kernel: tpu_custom_call.1
= control target key start
LH: loop header
LB: loop body
LE: loop exit
PB: predicated region body
PF: predicated region fallthrough
CT: control target
= control target key end

     0   :  { %10 = vsyncpa [#allocation3], 0  ;;  %s2371_s0 = inlined_call_operand.vmem [shape: f32[8,512], index: 0, kind: input, shape index: {}]   ;;  %s2372_s1 = inlined_call_operand.vmem [shape: f32[32,21], index: 1, kind: input, shape index: {}]   ;;  %s2373_s2 = inlined_call_operand.hbm [shape: f32[2,8,16], index: 2, kind: input, shape index: {}]   ;;  %s2374_s3 = inlined_call_operand.vmem [shape: f32[8,2], index: 3, kind: input, shape index: {}]   ;;  %s2375_s4 = inlined_call_operand.vmem [shape: f32[6,512], index: 4, kind: input, shape index: {}]   ;;  %s2376_s5 = inlined_call_operand.hbm [shape: f32[8,512], index: 5, kind: output, shape index: {}]  }
   0x1   :  { %12 = vsyncpa [#allocation3 + $0x1], 0 }
   0x2   :  { %13 = vsyncpa [#allocation4], 0  ;;  %s1659_s18 = smov 0   ;;  %s1661_s19 = smov 0  }
   0x3   :  { %s1663_s20 = smov 0   ;;  %s1665_s21 = smov 0  }
   0x4 LB: > { %s1678_s22 = sadd.s32 4294967295, %s1604_s21   ;;  %s1681_s23 = sadd.s32 1, %s1604_s21   ;;  %s1604_s21 = sphi %s1665_s21, %s2408_s21   ;;  %s1600_s20 = sphi %s1663_s20, %s2407_s20   ;;  %s1596_s19 = sphi %s1661_s19, %s2406_s19   ;;  %s1592_s18 = sphi %s1659_s18, %s2405_s18  }
   0x5   : > { %s70_s24 = ssub.s32 %s1604_s21, %s1681_s23  ;;  %s73_s25 = sadd.s32 1, %s1600_s20 }
   0x6   : > { %p71_p0 = scmp.eq.s32.totalorder %s70_s24, 0  ;;  %p80_p1 = scmp.ne.s32.totalorder %s1600_s20, %s1596_s19 }
   0x7   : > { %p81_p2 = scmp.eq.s32.totalorder %s1604_s21, 0  ;;  %p86_p3 = scmp.ne.s32.totalorder %s1596_s19, %s1592_s18 }
   0x8   : > { %s1691_s26 = scalar_select %p71_p0, %s1600_s20, %s73_s25  }
   0x9   : > { %p82_p4 = por %p81_p2, %p80_p1  ;;  %p87_p5 = scmp.eq.s32.totalorder %s1678_s22, 0 }
   0xa   : > { %p1418_p6 = scmp.lt.s32.totalorder %s1604_s21, 2  ;;  %s191_s28 = sand.u32 1, %s1600_s20  }
   0xb   : > { %p1695_p7 = por %p87_p5, %p86_p3  ;;  %s1381_s29 = sshll.u32 %s191_s28, 3 }
   0xc   : > { %s1382_s30 = sshll.u32 %s1604_s21, 7  ;;  %s195_s9 = scalar_lea.vmem [#allocation2], %s1381_s29 }
   0xd   : > { %s1704_s8 = scalar_lea.hbm %s2373_s2, %s1382_s30  ;;  %s202_s10 = sshll.u32 %s195_s9, 4  ;;  %s1706_s10 = int_to_ptr.vmem [resolvable:$true] %s202_s10 }
   0xe   : > { %p1708_p8 = pnand %p1418_p6, %p82_p4  ;;  %s192_s12 = scalar_lea.sflag [#allocation3], %s191_s28 }
   0xf   : > { %s1510_s13 = scalar_lea.hbm %s1704_s8, 128  ;;  %s1515_s16 = scalar_lea.hbm %s2373_s2, 256 }
  0x10   : > { %p1511_p11 = scmp.ne.s32.totalorder %s1704_s8, %s1510_s13  ;;  %p1512_p12 = pneg %p1708_p8 }
  0x11   : > { %p1516_p1 = scmp.lt.u32.totalorder %s1704_s8, %s2373_s2  ;;  %p1517_p2 = scmp.lt.u32.totalorder %s1515_s16, %s1510_s13 }
  0x12   : > { %p1513_p13 = pnand %p1512_p12, %p1511_p11  ;;  %p1519_p4 = scmp.lt.u32.totalorder %s1510_s13, %s1704_s8 }
  0x13   : > { %p1518_p3 = por %p1517_p2, %p1516_p1 }
  0x14   : > { %p1514_p0 = pneg %p1513_p13 }
  0x15   : > { %p1520_p5 = por %p1519_p4, %p1518_p3 }
  0x17   : > { %p1521_p6 = pnand %p1520_p5, %p1514_p0 }
  0x19   : > { %1524 = shalt.err (!%p1521_p6)
}
  0x1a   : > { %s1525_s24 = scalar_lea.vmem %s1706_s10, 128  ;;  %s1606_s25 = smov [#allocation2]  }
  0x1b   : > { %p1526_p11 = scmp.ne.s32.totalorder %s1706_s10, %s1525_s24  ;;  %s1530_s28 = sshll.u32 %s1606_s25, 4  ;;  %s1531_s28 = int_to_ptr.vmem [resolvable:$false] %s1530_s28 }
  0x1c   : > { %s1532_s29 = scalar_lea.vmem %s1531_s28, 256  ;;  %p1533_p10 = scmp.lt.s32.totalorder %s1706_s10, %s1531_s28 }
  0x1d   : > { %p1528_p13 = pnand %p1526_p11, %p1512_p12  ;;  %p1534_p1 = scmp.lt.s32.totalorder %s1532_s29, %s1525_s24 }
  0x1f   : > { %p1529_p9 = pneg %p1528_p13  ;;  %p1535_p2 = por %p1534_p1, %p1533_p10 }
  0x21   : > { %p1536_p3 = pnand %p1535_p2, %p1529_p9 }
  0x23   : > { %1539 = shalt.err (!%p1536_p3)
}
  0x24   : > { %1417 = dma.hbm_to_vmem [thread:$0]  (!%p1708_p8), %s1704_s8, 128, %s1706_s10, %s192_s12  }
  0x25   : > { %p2389_p0 = scmp.lt.s32.totalorder %s1604_s21, 3  ;;  %p2390_p4 = scmp.ge.s32.totalorder %s1604_s21, 1 }
  0x27   : > { %p208_p12 = pnand %p2390_p4, %p2389_p0 }
  0x29   : > { %211 = sbr.rel (%p208_p12) target bundleno = 2110 (0x83e), region = 40 }
  0x30   : > { %s213_s30 = sand.u32 1, %s1596_s19  }
  0x31   : > { %s1744_s6 = sshll.u32 %s213_s30, 3  ;;  %s214_s7 = scalar_lea.sflag [#allocation3], %s213_s30 }
  0x32   : > { %s217_s9 = scalar_lea.vmem [#allocation2], %s1744_s6 }
  0x33   : > { %1583 = dma.done.wait (%p1695_p7), %s214_s7, 128  }
  0x34   : > { %1585 = vsyncadd (%p1695_p7), %s214_s7, 4294967168  ;;  %s1385_s11 = sshll.u32 %s1678_s22, 1  ;;  %v1607_v0 = vmov 0.0   ;;  %v1760_v1 = vld [vmem:[%s2371_s0 + $0x8] sm:$0xff]  ;;  %v1765_v2 = vld [vmem:[%s2371_s0] sm:$0xff]  ;;  %vm260_vm0 = vcmask 64512  }
  0x35   : > { %331 = vmatprep.mubr.f32.mxu0 %v1607_v0  ;;  %p245_p8 = scmp.lt.s32.totalorder %s1385_s11, 3  ;;  %408 = vmatprep.mubr.f32.mxu1 %v1607_v0  ;;  %2391 = vst [vmem:[#allocation8_spill] sm:$0xff] %v1760_v1  ;;  %2392 = vst [vmem:[#allocation9_spill] sm:$0xff] %v1765_v2  ;;  %v1774_v4 = vld [vmem:[%s2371_s0 + $0x18] sm:$0xff]  ;;  %v1779_v5 = vld [vmem:[%s2371_s0 + $0x10] sm:$0xff]  ;;  %v1608_v35 = vmov 17  }
  0x36   : > { %267 = vmatprep.subr.mxu0 %v1760_v1  ;;  %2393 = vst [vmem:[#allocation10_spill] sm:$0xff] %v1774_v4  ;;  %2394 = vst [vmem:[#allocation11_spill] sm:$0xff] %v1779_v5  ;;  %344 = vmatprep.subr.mxu1 %v1774_v4  ;;  %v1609_v52 = vmov 18   ;;  %s1610_s25 = smov 1   ;;  %v1611_v63 = vmov 8   ;;  %s1618_s8 = smov 114  }
  0x37   : > { %s2410_s11 = smov (!%p245_p8, %s1385_s11), 3  ;;  %268 = vmatpush1.msra.mxu0 %v1765_v2  ;;  %345 = vmatpush1.msra.mxu1 %v1779_v5  ;;  %s1619_s10 = smov 14   ;;  %vm1076_vm5 = vcmask 130048  }
  0x38   : > { %s1386_s21 = sshll.u32 %s2410_s11, 3  ;;  %1475 = vset.pattern.permute.xlu1 %v1608_v35  ;;  %1476 = vset.pattern.permute.xlu0 %v1609_v52  ;;  %s1622_s27 = smov 127  }
  0x39   : > { %s1755_s12 = scalar_lea.vmem %s2372_s1, %s1386_s21  ;;  %p1393_p7 = scmp.ne.s32.totalorder %s1678_s22, 0 }
  0x3a   : > { %v1768_v3 = vld [vmem:[%s1755_s12] sm:$0xff]  ;;  %v1787_v6 = vld [vmem:[%s1755_s12 + $0x8] sm:$0xff] }
  0x3b   : > { %1387 = vmatmul.mubr.msk.f32.vlgmr.msra.gmra.mrb[0].mxu0 %vm260_vm0, %v1768_v3  ;;  %1389 = vmatmul.mubr.msk.f32.vlgmr.msra.gmra.mrb[0].mxu1 %vm260_vm0, %v1768_v3 }
  0x3c   : > { %337 = vmatprep.mubr.f32.mxu0 %v1607_v0  ;;  %414 = vmatprep.mubr.f32.mxu1 %v1607_v0 }
  0x3f   : > { %1388 = vmatmul.mubr.msk.f32.gmra.mrb[2].mxu0 %vm260_vm0, %v1787_v6  ;;  %1390 = vmatmul.mubr.msk.f32.gmra.mrb[2].mxu1 %vm260_vm0, %v1787_v6 }
  0x40   : > { %1144 = vmatprep.mubr.f32.mxu0 %v1607_v0  ;;  %1215 = vmatprep.mubr.f32.mxu1 %v1607_v0  ;;  %v1612_v0 = vmov 14  }
 0x10e   : > { %v1791_v7 = vpop.f32.mrb[0].mxu0  ;;  %v1797_v10 = vpop.f32.mrb[0].mxu1 }
 0x10f   : > { %v431_v8 = vmul.f32 %v1791_v7, %v1791_v7  ;;  %v1795_v9 = vpop.f32.mrb[1].mxu0  ;;  %v1803_v13 = vpop.f32.mrb[1].mxu1  ;;  %v433_v14 = vmul.f32 %v1797_v10, %v1797_v10 }
 0x110   : > { %v421_v11 = vadd.f32 %v1795_v9, %v1791_v7  ;;  %v432_v12 = vmul.f32 %v1795_v9, %v1795_v9  ;;  %v434_v26 = vmul.f32 %v1803_v13, %v1803_v13 }
 0x112   : > { %v1807_v15 = vpop.f32.mrb[2].mxu0  ;;  %v422_v16 = vadd.f32 %v421_v11, %v1797_v10  ;;  %v439_v17 = vadd.f32 %v432_v12, %v431_v8  ;;  %v1814_v20 = vpop.f32.mrb[2].mxu1  ;;  %v1613_v8 = vmov 11   ;;  %v1614_v11 = vmov 10  }
 0x113   : > { %v435_v18 = vmul.f32 %v1807_v15, %v1807_v15  ;;  %v1812_v19 = vpop.f32.mrb[3].mxu0  ;;  %v437_v23 = vmul.f32 %v1814_v20, %v1814_v20  ;;  %v1823_v25 = vpop.f32.mrb[3].mxu1  ;;  %v1615_v12 = vmov 16  }
 0x114   : > { %v426_v21 = vadd.f32 %v1812_v19, %v1807_v15  ;;  %v436_v22 = vmul.f32 %v1812_v19, %v1812_v19  ;;  %v423_v24 = vadd.f32 %v422_v16, %v1803_v13  ;;  %v440_v27 = vadd.f32 %v439_v17, %v433_v14 }
 0x115   : > { %v438_v29 = vmul.f32 %v1823_v25, %v1823_v25  ;;  %v1616_v14 = vmov 13   ;;  %v1617_v16 = vmov 9   ;;  %v529_v17 = vlaneseq }
 0x116   : > { %424 = vadd.xlane.f32.xlu0 %v423_v24  ;;  %v427_v28 = vadd.f32 %v426_v21, %v1814_v20  ;;  %v444_v30 = vadd.f32 %v436_v22, %v435_v18  ;;  %v441_v31 = vadd.f32 %v440_v27, %v434_v26  ;;  %v1858_v27 = vld [vmem:[%s2375_s4] sm:$0x3f] }
 0x117   : > { %v1850_v21 = vshrl.u32 %v529_v17, 7 }
 0x118   : > { %v428_v32 = vadd.f32 %v427_v28, %v1823_v25  ;;  %v445_v33 = vadd.f32 %v444_v30, %v437_v23  ;;  %442 = vadd.xlane.f32.xlu1 %v441_v31 }
 0x119   : > { %v531_v24 = vsub.s32 1, %v1850_v21 }
 0x11a   : > { %429 = vadd.xlane.f32.xlu0 %v428_v32  ;;  %v446_v34 = vadd.f32 %v445_v33, %v438_v29  ;;  %v1864_v32 = vld [vmem:[%s2375_s4 + $0x8] sm:$0x3f] }
 0x11c   : > { %447 = vadd.xlane.f32.xlu1 %v446_v34 }
 0x1a3   : > { %v425_v36 = vpop.xlane.xlu0 %424 }
 0x1a4   : > { %v449_v37 = vmul.f32 0.0025510204, %v425_v36 }
 0x1a5   : > { %v443_v39 = vpop.xlane.xlu1 %442 }
 0x1a6   : > { %v453_v38 = vmul.f32 %v449_v37, %v449_v37  ;;  %v451_v40 = vmul.f32 0.0025510204, %v443_v39 }
 0x1a7   : > { %v430_v41 = vpop.xlane.xlu0 %429 }
 0x1a8   : > { %v450_v42 = vmul.f32 0.0025510204, %v430_v41  ;;  %v455_v43 = vsub.f32 %v451_v40, %v453_v38  ;;  %v1877_v40 = vld [vmem:[%s2375_s4 + $0x10] sm:$0x3f] }
 0x1a9   : > { %v448_v45 = vpop.xlane.xlu1 %447 }
 0x1aa   : > { %v454_v44 = vmul.f32 %v450_v42, %v450_v42  ;;  %v457_v46 = vmax.f32 %v455_v43, 0.0  ;;  %v452_v47 = vmul.f32 0.0025510204, %v448_v45 }
 0x1ac   : > { %v459_v48 = vadd.f32 1e-05, %v457_v46  ;;  %v456_v49 = vsub.f32 %v452_v47, %v454_v44  ;;  %v1893_v46 = vld [vmem:[%s2375_s4 + $0x18] sm:$0x3f] }
 0x1ae   : > { %1496 = vrsqrt.f32 %v459_v48  ;;  %v458_v50 = vmax.f32 %v456_v49, 0.0 }
 0x1b0   : > { %v460_v51 = vadd.f32 1e-05, %v458_v50 }
 0x1b2   : > { %1498 = vrsqrt.f32 %v460_v51  ;;  %v1904_v51 = vrot.slane %v1893_v46, %v531_v24 }
 0x1b4   : > { %2397 = vst [vmem:[#allocation14_spill] sm:$0xff] %v1904_v51 }
 0x1b8   : > { %v1497_v53 = vpop.eup %1496 }
 0x1b9   : > { %v463_v54 = vmul.f32 %v1497_v53, %v1768_v3 }
 0x1bb   : > { %v465_v55 = vmul.f32 %v463_v54, %v449_v37 }
 0x1bc   : > { %v1499_v56 = vpop.eup %1498 }
 0x1bd   : > { %469 = vrot.lane.b32.xlu0 %v465_v55, %s1610_s25  ;;  %v464_v57 = vmul.f32 %v1499_v56, %v1787_v6 }
 0x1bf   : > { %v466_v58 = vmul.f32 %v464_v57, %v450_v42 }
 0x1c1   : > { %471 = vrot.lane.b32.xlu1 %v466_v58, %s1610_s25 }
 0x1c5   : > { %479 = vperm.xlu1 %1475, %v463_v54  }
 0x1c9   : > { %484 = vperm.xlu1 %1475, %v464_v57  }
 0x1cd   : > { %1477 = vset.pattern.permute.xlu1 %v1609_v52 }
 0x22f   : > { %v470_v59 = vpop.permute.xlu0 %469 }
 0x230   : > { %v475_v60 = vsub.f32 %v1768_v3, %v470_v59 }
 0x232   : > { %497 = vperm.xlu0 %1476, %v475_v60  }
 0x233   : > { %v472_v61 = vpop.permute.xlu1 %471 }
 0x234   : > { %v476_v62 = vsub.f32 %v1787_v6, %v472_v61 }
 0x236   : > { %502 = vperm.xlu1 %1477, %v476_v62   ;;  %1479 = vset.pattern.permute.xlu0 %v1611_v63 }
 0x237   : > { %658 = vperm.xlu0 %1479, %v1787_v6  }
 0x23a   : > { %1478 = vset.pattern.permute.xlu1 %v1611_v63 }
 0x23b   : > { %654 = vperm.xlu1 %1478, %v1768_v3   ;;  %1481 = vset.pattern.permute.xlu0 %v1612_v0 }
 0x23c   : > { %694 = vperm.xlu0 %1481, %v1768_v3  }
 0x23f   : > { %1480 = vset.pattern.permute.xlu1 %v1613_v8 }
 0x240   : > { %670 = vperm.xlu1 %1480, %v1768_v3   ;;  %1484 = vset.pattern.permute.xlu0 %v1614_v11 }
 0x241   : > { %786 = vperm.xlu0 %1484, %v1787_v6  }
 0x244   : > { %674 = vperm.xlu1 %1480, %v1787_v6   ;;  %v480_v18 = vpop.permute.xlu1 %479 }
 0x245   : > { %1486 = vset.pattern.permute.xlu0 %v1615_v12  ;;  %v487_v22 = vmul.f32 %v480_v18, %v1791_v7  ;;  %v488_v23 = vmul.f32 %v480_v18, %v1795_v9  ;;  %v489_v29 = vmul.f32 %v480_v18, %v1797_v10  ;;  %v1867_v7 = vrot.slane %v1858_v27, %v531_v24 }
 0x246   : > { %822 = vperm.xlu0 %1486, %v1768_v3   ;;  %v490_v35 = vmul.f32 %v480_v18, %v1803_v13  ;;  %v1872_v10 = vrot.slane %v1864_v32, %v531_v24 }
 0x248   : > { %1482 = vset.pattern.permute.xlu1 %v1612_v0  ;;  %v485_v26 = vpop.permute.xlu1 %484  ;;  %2395 = vst [vmem:[#allocation12_spill] sm:$0xff] %v1872_v10 }
 0x249   : > { %698 = vperm.xlu1 %1482, %v1787_v6   ;;  %v491_v37 = vmul.f32 %v485_v26, %v1807_v15  ;;  %v492_v13 = vmul.f32 %v485_v26, %v1812_v19  ;;  %v1888_v15 = vrot.slane %v1877_v40, %v531_v24  ;;  %v493_v50 = vmul.f32 %v485_v26, %v1814_v20 }
 0x24a   : > { %1489 = vset.pattern.permute.xlu0 %v1617_v16  ;;  %v494_v57 = vmul.f32 %v485_v26, %v1823_v25 }
 0x24b   : > { %2396 = vst [vmem:[#allocation13_spill] sm:$0xff] %v1888_v15 }
 0x24d   : > { %1483 = vset.pattern.permute.xlu1 %v1614_v11 }
 0x24e   : > { %782 = vperm.xlu1 %1483, %v1768_v3  }
 0x252   : > { %1485 = vset.pattern.permute.xlu1 %v1616_v14  ;;  %v1621_v14 = vmov 15  }
 0x253   : > { %798 = vperm.xlu1 %1485, %v1768_v3  }
 0x257   : > { %802 = vperm.xlu1 %1485, %v1787_v6  }
 0x25b   : > { %1487 = vset.pattern.permute.xlu1 %v1615_v12  ;;  %v1620_v12 = vmov 12  }
 0x25c   : > { %826 = vperm.xlu1 %1487, %v1787_v6  }
 0x260   : > { %1488 = vset.pattern.permute.xlu1 %v1617_v16 }
 0x2b1   : > { %v498_v28 = vpop.permute.xlu0 %497 }
 0x2b2   : > { %v505_v30 = vadd.f32 %v498_v28, %v487_v22  ;;  %v506_v31 = vadd.f32 %v498_v28, %v488_v23  ;;  %v507_v9 = vadd.f32 %v498_v28, %v489_v29  ;;  %v508_v39 = vadd.f32 %v498_v28, %v490_v35 }
 0x2b4   : > { %v513_v33 = vmax.f32 %v505_v30, 0.0  ;;  %v514_v34 = vmax.f32 %v506_v31, 0.0  ;;  %v515_v41 = vmax.f32 %v507_v9, 0.0  ;;  %v516_v45 = vmax.f32 %v508_v39, 0.0 }
 0x2b5   : > { %v503_v36 = vpop.permute.xlu1 %502 }
 0x2b6   : > { %v521_v38 = vmin.f32 %v513_v33, 6.0  ;;  %v522_v42 = vmin.f32 %v514_v34, 6.0  ;;  %v509_v44 = vadd.f32 %v503_v36, %v491_v37  ;;  %v523_v47 = vmin.f32 %v515_v41, 6.0  ;;  %v1963_v24 = vpop.permute.xlu0 %658 }
 0x2b7   : > { %v510_v48 = vadd.f32 %v503_v36, %v492_v13  ;;  %v524_v52 = vmin.f32 %v516_v45, 6.0  ;;  %v511_v54 = vadd.f32 %v503_v36, %v493_v50  ;;  %v512_v20 = vadd.f32 %v503_v36, %v494_v57 }
 0x2b8   : > { %v1880_v43 = vmul.f32 %v1867_v7, %v521_v38  ;;  %v1896_v19 = vmul.f32 %v1872_v10, %v522_v42  ;;  %v517_v49 = vmax.f32 %v509_v44, 0.0  ;;  %v1907_v53 = vmul.f32 %v1888_v15, %v523_v47 }
 0x2b9   : > { %v518_v55 = vmax.f32 %v510_v48, 0.0  ;;  %v1915_v58 = vmul.f32 %v1904_v51, %v524_v52  ;;  %v519_v59 = vmax.f32 %v511_v54, 0.0  ;;  %v520_v25 = vmax.f32 %v512_v20, 0.0 }
 0x2ba   : > { %604 = vrot.lane.b32.xlu1 %v1880_v43, %s1618_s8  ;;  %553 = vrot.lane.b32.xlu0 %v1880_v43, %s1619_s10  ;;  %v525_v56 = vmin.f32 %v517_v49, 6.0  ;;  %v1955_v16 = vpop.permute.xlu1 %654  ;;  %v1982_v34 = vand.u32 127, %v529_v17  ;;  %v631_v37 = vsub.s32 2, %v1850_v21  ;;  %v582_v38 = vsub.s32 0, %v1850_v21 }
 0x2bb   : > { %v526_v60 = vmin.f32 %v518_v55, 6.0  ;;  %v527_v62 = vmin.f32 %v519_v59, 6.0  ;;  %v528_v0 = vmin.f32 %v520_v25, 6.0  ;;  %v1967_v28 = vpop.permute.xlu0 %694 }
 0x2bc   : > { %v1918_v61 = vmul.f32 %v1867_v7, %v525_v56  ;;  %vm620_vm1 = vcmp.lt.s32.totalorder %v1982_v34, 114  ;;  %vm571_vm2 = vcmp.lt.s32.totalorder %v1982_v34, 14  ;;  %v632_v42 = vrot.slane %v1858_v27, %v631_v37 }
 0x2bd   : > { %v1925_v63 = vmul.f32 %v1872_v10, %v526_v60  ;;  %v1932_v8 = vmul.f32 %v1888_v15, %v527_v62  ;;  %v1939_v11 = vmul.f32 %v1904_v51, %v528_v0  ;;  %v587_v44 = vrot.slane %v1864_v32, %v582_v38 }
 0x2be   : > { %608 = vrot.lane.b32.xlu1 %v1896_v19, %s1618_s8  ;;  %557 = vrot.lane.b32.xlu0 %v1896_v19, %s1619_s10  ;;  %v583_v13 = vrot.slane %v1858_v27, %v582_v38  ;;  %v636_v47 = vrot.slane %v1864_v32, %v631_v37  ;;  %vm861_vm3 = vcmp.lt.s32.totalorder %v1982_v34, 1  ;;  %vm918_vm4 = vcmp.lt.s32.totalorder %v1982_v34, 127 }
 0x2bf   : > { %v1957_v18 = vpop.permute.xlu1 %670 }
 0x2c0   : > { %v1971_v29 = vpop.permute.xlu0 %786  ;;  %v677_v57 = vmul.f32 %v1957_v18, %v1880_v43 }
 0x2c2   : > { %612 = vrot.lane.b32.xlu1 %v1907_v53, %s1618_s8  ;;  %561 = vrot.lane.b32.xlu0 %v1907_v53, %s1619_s10 }
 0x2c3   : > { %v1959_v22 = vpop.permute.xlu1 %674 }
 0x2c5   : > { %v1977_v31 = vpop.permute.xlu0 %822 }
 0x2c6   : > { %555 = vrot.lane.b32.xlu1 %v1918_v61, %s1619_s10  ;;  %565 = vrot.lane.b32.xlu0 %v1915_v58, %s1619_s10 }
 0x2c8   : > { %v1961_v23 = vpop.permute.xlu1 %698 }
 0x2ca   : > { %559 = vrot.lane.b32.xlu1 %v1925_v63, %s1619_s10  ;;  %606 = vrot.lane.b32.xlu0 %v1918_v61, %s1618_s8 }
 0x2cd   : > { %v1965_v26 = vpop.permute.xlu1 %782 }
 0x2ce   : > { %563 = vrot.lane.b32.xlu1 %v1932_v8, %s1619_s10  ;;  %610 = vrot.lane.b32.xlu0 %v1925_v63, %s1618_s8 }
 0x2d2   : > { %567 = vrot.lane.b32.xlu1 %v1939_v11, %s1619_s10  ;;  %614 = vrot.lane.b32.xlu0 %v1932_v8, %s1618_s8 }
 0x2d6   : > { %616 = vrot.lane.b32.xlu1 %v1915_v58, %s1618_s8  ;;  %618 = vrot.lane.b32.xlu0 %v1939_v11, %s1618_s8 }
 0x2da   : > { %718 = vperm.xlu1 %1488, %v1768_v3   ;;  %722 = vperm.xlu0 %1489, %v1787_v6  }
 0x2de   : > { %1490 = vset.pattern.permute.xlu1 %v1620_v12  ;;  %1491 = vset.pattern.permute.xlu0 %v1621_v14 }
 0x2df   : > { %734 = vperm.xlu1 %1490, %v1768_v3   ;;  %758 = vperm.xlu0 %1491, %v1768_v3   ;;  %v1969_v3 = vpop.permute.xlu1 %798 }
 0x2e3   : > { %738 = vperm.xlu1 %1490, %v1787_v6   ;;  %v1973_v30 = vpop.permute.xlu1 %802 }
 0x2e7   : > { %1492 = vset.pattern.permute.xlu1 %v1621_v14  ;;  %v678_v14 = vmul.f32 %v1957_v18, %v1896_v19 }
 0x2e8   : > { %762 = vperm.xlu1 %1492, %v1787_v6   ;;  %v1975_v6 = vpop.permute.xlu1 %826 }
 0x32c   : > { %v1979_v9 = vpop.permute.xlu1 %604  ;;  %v554_v33 = vpop.permute.xlu0 %553 }
 0x330   : > { %v609_v35 = vpop.permute.xlu1 %608  ;;  %v558_v36 = vpop.permute.xlu0 %557 }
 0x331   : > { %v625_v17 = vsel %vm620_vm1, %v1979_v9, %v609_v35  ;;  %v576_v45 = vsel %vm571_vm2, %v554_v33, %v558_v36 }
 0x332   : > { %v2001_v54 = vmul.f32 %v632_v42, %v625_v17  ;;  %v2003_v55 = vmul.f32 %v587_v44, %v576_v45 }
 0x334   : > { %v613_v39 = vpop.permute.xlu1 %612  ;;  %v562_v41 = vpop.permute.xlu0 %561  ;;  %v662_v62 = vmul.f32 %v1955_v16, %v2003_v55  ;;  %v701_v12 = vmul.f32 %v1967_v28, %v2001_v54 }
 0x335   : > { %v623_v50 = vsel %vm620_vm1, %v609_v35, %v613_v39  ;;  %v574_v4 = vsel %vm571_vm2, %v558_v36, %v562_v41 }
 0x336   : > { %v2009_v20 = vmul.f32 %v636_v47, %v623_v50 }
 0x338   : > { %v556_v48 = vpop.permute.xlu1 %555  ;;  %v566_v49 = vpop.permute.xlu0 %565  ;;  %v702_v50 = vmul.f32 %v1967_v28, %v2009_v20 }
 0x339   : > { %v578_v52 = vsel %vm571_vm2, %v566_v49, %v554_v33  ;;  %v595_v33 = vrot.slane %v1893_v46, %v582_v38 }
 0x33a   : > { %v2005_v56 = vmul.f32 %v583_v13, %v578_v52  ;;  %v572_v52 = vsel %vm571_vm2, %v562_v41, %v566_v49  ;;  %v640_v41 = vrot.slane %v1877_v40, %v631_v37 }
 0x33b   : > { %v2028_v5 = vmul.f32 %v595_v33, %v572_v52 }
 0x33c   : > { %v661_v59 = vmul.f32 %v1955_v16, %v2005_v56  ;;  %v560_v60 = vpop.permute.xlu1 %559  ;;  %v607_v25 = vpop.permute.xlu0 %606 }
 0x33d   : > { %v577_v1 = vsel %vm571_vm2, %v556_v48, %v560_v60 }
 0x33e   : > { %v685_v0 = vadd.f32 %v677_v57, %v661_v59  ;;  %v686_v57 = vadd.f32 %v678_v14, %v662_v62  ;;  %v591_v59 = vrot.slane %v1877_v40, %v582_v38  ;;  %v644_v14 = vrot.slane %v1893_v46, %v631_v37 }
 0x33f   : > { %v2049_v52 = vmul.f32 %v587_v44, %v577_v1  ;;  %v682_v44 = vmul.f32 %v1959_v22, %v1925_v63 }
 0x340   : > { %v564_v35 = vpop.permute.xlu1 %563  ;;  %v611_v17 = vpop.permute.xlu0 %610  ;;  %v709_v45 = vadd.f32 %v701_v12, %v685_v0  ;;  %v710_v51 = vadd.f32 %v702_v50, %v686_v57  ;;  %v2047_v50 = vmul.f32 %v591_v59, %v574_v4  ;;  %v681_v4 = vmul.f32 %v1959_v22, %v1918_v61 }
 0x341   : > { %v626_v0 = vsel %vm620_vm1, %v607_v25, %v611_v17 }
 0x342   : > { %845 = vrot.lane.b32.xlu1 %v709_v45, %s1610_s25  ;;  %v679_v45 = vmul.f32 %v1957_v18, %v1907_v53  ;;  %v2051_v57 = vmul.f32 %v632_v42, %v626_v0 }
 0x344   : > { %v568_v12 = vpop.permute.xlu1 %567  ;;  %v615_v2 = vpop.permute.xlu0 %614 }
 0x345   : > { %v573_v49 = vsel %vm571_vm2, %v564_v35, %v568_v12  ;;  %v579_v38 = vsel %vm571_vm2, %v568_v12, %v556_v48  ;;  %v624_v36 = vsel %vm620_vm1, %v611_v17, %v615_v2  ;;  %v664_v48 = vmul.f32 %v1955_v16, %v2028_v5 }
 0x346   : > { %v2038_v62 = vmul.f32 %v583_v13, %v579_v38  ;;  %849 = vrot.lane.b32.xlu1 %v710_v51, %s1610_s25  ;;  %v680_v13 = vmul.f32 %v1957_v18, %v1915_v58  ;;  %v2057_v51 = vmul.f32 %v595_v33, %v573_v49  ;;  %v2063_v1 = vmul.f32 %v636_v47, %v624_v36 }
 0x347   : > { %v663_v47 = vmul.f32 %v1955_v16, %v2047_v50  ;;  %v575_v36 = vsel %vm571_vm2, %v560_v60, %v564_v35  ;;  %v812_v16 = vmul.f32 %v1973_v30, %v1939_v11 }
 0x348   : > { %v665_v37 = vmul.f32 %v1963_v24, %v2038_v62  ;;  %v617_v17 = vpop.permute.xlu1 %616  ;;  %v619_v12 = vpop.permute.xlu0 %618 }
 0x349   : > { %v621_v42 = vsel %vm620_vm1, %v613_v39, %v617_v17  ;;  %v627_v18 = vsel %vm620_vm1, %v617_v17, %v1979_v9  ;;  %v628_v49 = vsel %vm620_vm1, %v619_v12, %v607_v25  ;;  %v666_v39 = vmul.f32 %v1963_v24, %v2049_v52 }
 0x34a   : > { %v2072_v33 = vmul.f32 %v640_v41, %v621_v42  ;;  %v2074_v0 = vmul.f32 %v644_v14, %v627_v18  ;;  %v689_v38 = vadd.f32 %v681_v4, %v665_v37  ;;  %v705_v9 = vmul.f32 %v1961_v23, %v2051_v57 }
 0x34b   : > { %v796_v17 = vmul.f32 %v1971_v29, %v2057_v51  ;;  %v688_v42 = vadd.f32 %v680_v13, %v664_v48  ;;  %v2092_v18 = vmul.f32 %v644_v14, %v628_v49  ;;  %v706_v37 = vmul.f32 %v1961_v23, %v2063_v1 }
 0x34c   : > { %v704_v25 = vmul.f32 %v1967_v28, %v2074_v0  ;;  %v713_v10 = vadd.f32 %v705_v9, %v689_v38  ;;  %v789_v4 = vmul.f32 %v1965_v26, %v2005_v56  ;;  %v622_v60 = vsel %vm620_vm1, %v615_v2, %v619_v12 }
 0x34d   : > { %v703_v13 = vmul.f32 %v1967_v28, %v2072_v33  ;;  %v2102_v48 = vmul.f32 %v591_v59, %v575_v36  ;;  %v668_v14 = vmul.f32 %v1963_v24, %v2057_v51  ;;  %v690_v49 = vadd.f32 %v682_v44, %v666_v39 }
 0x34e   : > { %v712_v35 = vadd.f32 %v704_v25, %v688_v42  ;;  %847 = vrot.lane.b32.xlu0 %v713_v10, %s1610_s25  ;;  %v805_v38 = vmul.f32 %v1969_v3, %v1880_v43  ;;  %v687_v9 = vadd.f32 %v679_v45, %v663_v47  ;;  %v2110_v15 = vadd.f32 %v812_v16, %v796_v17 }
 0x34f   : > { %v684_v2 = vmul.f32 %v1959_v22, %v1939_v11  ;;  %v2114_v28 = vmul.f32 %v640_v41, %v622_v60  ;;  %v714_v59 = vadd.f32 %v706_v37, %v690_v49  ;;  %v708_v12 = vmul.f32 %v1961_v23, %v2092_v18 }
 0x350   : > { %857 = vrot.lane.b32.xlu1 %v712_v35, %s1610_s25  ;;  %v711_v36 = vadd.f32 %v703_v13, %v687_v9  ;;  %v813_v10 = vadd.f32 %v805_v38, %v789_v4  ;;  %v667_v44 = vmul.f32 %v1963_v24, %v2102_v48  ;;  %v790_v45 = vmul.f32 %v1965_v26, %v2003_v55 }
 0x351   : > { %v692_v39 = vadd.f32 %v684_v2, %v668_v14  ;;  %v829_v41 = vmul.f32 %v1977_v31, %v2001_v54  ;;  %v683_v47 = vmul.f32 %v1959_v22, %v1932_v8  ;;  %v793_v17 = vmul.f32 %v1971_v29, %v2038_v62 }
 0x352   : > { %851 = vrot.lane.b32.xlu0 %v714_v59, %s1610_s25  ;;  %v707_v24 = vmul.f32 %v1961_v23, %v2114_v28  ;;  %v806_v25 = vmul.f32 %v1969_v3, %v1896_v19  ;;  %v830_v37 = vmul.f32 %v1977_v31, %v2009_v20  ;;  %v809_v4 = vmul.f32 %v1973_v30, %v1918_v61 }
 0x353   : > { %v716_v42 = vadd.f32 %v708_v12, %v692_v39  ;;  %v837_v16 = vadd.f32 %v829_v41, %v813_v10  ;;  %v791_v22 = vmul.f32 %v1965_v26, %v2047_v50  ;;  %v691_v60 = vadd.f32 %v683_v47, %v667_v44 }
 0x354   : > { %853 = vrot.lane.b32.xlu1 %v711_v36, %s1610_s25  ;;  %v807_v35 = vmul.f32 %v1969_v3, %v1907_v53  ;;  %v792_v23 = vmul.f32 %v1965_v26, %v2028_v5  ;;  %v794_v13 = vmul.f32 %v1971_v29, %v2049_v52  ;;  %v814_v14 = vadd.f32 %v806_v25, %v790_v45 }
 0x355   : > { %v795_v49 = vmul.f32 %v1971_v29, %v2102_v48  ;;  %v715_v2 = vadd.f32 %v707_v24, %v691_v60  ;;  %v817_v59 = vadd.f32 %v809_v4, %v793_v17  ;;  %v831_v12 = vmul.f32 %v1977_v31, %v2072_v33 }
 0x356   : > { %859 = vrot.lane.b32.xlu0 %v716_v42, %s1610_s25  ;;  %v808_v26 = vmul.f32 %v1969_v3, %v1915_v58  ;;  %v838_v36 = vadd.f32 %v830_v37, %v814_v14  ;;  %v810_v10 = vmul.f32 %v1973_v30, %v1925_v63  ;;  %v811_v44 = vmul.f32 %v1973_v30, %v1932_v8 }
 0x357   : > { %v833_v29 = vmul.f32 %v1975_v6, %v2051_v57  ;;  %v815_v39 = vadd.f32 %v807_v35, %v791_v22  ;;  %v834_v45 = vmul.f32 %v1975_v6, %v2063_v1  ;;  %v832_v3 = vmul.f32 %v1977_v31, %v2074_v0 }
 0x358   : > { %902 = vrot.lane.b32.xlu1 %v837_v16, %s1622_s27  ;;  %v816_v41 = vadd.f32 %v808_v26, %v792_v23  ;;  %v835_v47 = vmul.f32 %v1975_v6, %v2114_v28  ;;  %v818_v42 = vadd.f32 %v810_v10, %v794_v13  ;;  %v819_v24 = vadd.f32 %v811_v44, %v795_v49 }
 0x359   : > { %v719_v38 = vpop.permute.xlu1 %718  ;;  %v723_v9 = vpop.permute.xlu0 %722  ;;  %v841_v17 = vadd.f32 %v833_v29, %v817_v59  ;;  %v839_v30 = vadd.f32 %v831_v12, %v815_v39 }
 0x35a   : > { %855 = vrot.lane.b32.xlu0 %v715_v2, %s1610_s25  ;;  %v725_v25 = vmul.f32 %v719_v38, %v2005_v56  ;;  %v726_v16 = vmul.f32 %v719_v38, %v2003_v55  ;;  %v727_v37 = vmul.f32 %v719_v38, %v2047_v50  ;;  %v728_v4 = vmul.f32 %v719_v38, %v2028_v5 }
 0x35b   : > { %v842_v56 = vadd.f32 %v834_v45, %v818_v42  ;;  %v840_v55 = vadd.f32 %v832_v3, %v816_v41  ;;  %v843_v14 = vadd.f32 %v835_v47, %v819_v24  ;;  %v836_v5 = vmul.f32 %v1975_v6, %v2092_v18 }
 0x35c   : > { %906 = vrot.lane.b32.xlu1 %v838_v36, %s1622_s27 }
 0x35e   : > { %v735_v22 = vpop.permute.xlu1 %734  ;;  %904 = vrot.lane.b32.xlu0 %v841_v17, %s1622_s27  ;;  %v759_v13 = vpop.permute.xlu0 %758 }
 0x35f   : > { %v741_v60 = vmul.f32 %v735_v22, %v1880_v43  ;;  %v742_v31 = vmul.f32 %v735_v22, %v1896_v19  ;;  %v743_v35 = vmul.f32 %v735_v22, %v1907_v53  ;;  %v744_v23 = vmul.f32 %v735_v22, %v1915_v58 }
 0x360   : > { %910 = vrot.lane.b32.xlu1 %v839_v30, %s1622_s27  ;;  %v765_v19 = vmul.f32 %v759_v13, %v2001_v54  ;;  %v766_v53 = vmul.f32 %v759_v13, %v2009_v20  ;;  %v767_v58 = vmul.f32 %v759_v13, %v2072_v33  ;;  %v768_v2 = vmul.f32 %v759_v13, %v2074_v0 }
 0x361   : > { %v749_v50 = vadd.f32 %v741_v60, %v725_v25  ;;  %v750_v49 = vadd.f32 %v742_v31, %v726_v16  ;;  %v751_v43 = vadd.f32 %v743_v35, %v727_v37  ;;  %v752_v38 = vadd.f32 %v744_v23, %v728_v4 }
 0x362   : > { %v739_v59 = vpop.permute.xlu1 %738  ;;  %908 = vrot.lane.b32.xlu0 %v842_v56, %s1622_s27  ;;  %v729_v0 = vmul.f32 %v723_v9, %v2038_v62 }
 0x363   : > { %v745_v12 = vmul.f32 %v739_v59, %v1918_v61  ;;  %v746_v26 = vmul.f32 %v739_v59, %v1925_v63  ;;  %v747_v36 = vmul.f32 %v739_v59, %v1932_v8  ;;  %v748_v6 = vmul.f32 %v739_v59, %v1939_v11 }
 0x364   : > { %914 = vrot.lane.b32.xlu1 %v840_v55, %s1622_s27  ;;  %v774_v54 = vadd.f32 %v766_v53, %v750_v49  ;;  %v773_v10 = vadd.f32 %v765_v19, %v749_v50  ;;  %v2190_v20 = vadd.f32 %v767_v58, %v751_v43  ;;  %v2192_v33 = vadd.f32 %v768_v2, %v752_v38 }
 0x365   : > { %v730_v61 = vmul.f32 %v723_v9, %v2049_v52  ;;  %v731_v63 = vmul.f32 %v723_v9, %v2102_v48  ;;  %v732_v8 = vmul.f32 %v723_v9, %v2057_v51  ;;  %v753_v44 = vadd.f32 %v745_v12, %v729_v0 }
 0x366   : > { %912 = vrot.lane.b32.xlu0 %v843_v14, %s1622_s27  ;;  %v844_v52 = vadd.f32 %v836_v5, %v2110_v15  ;;  %v929_v15 = vsub.s32 5, %v1850_v21 }
 0x367   : > { %v754_v11 = vadd.f32 %v746_v26, %v730_v61  ;;  %v755_v29 = vadd.f32 %v747_v36, %v731_v63  ;;  %v756_v39 = vadd.f32 %v748_v6, %v732_v8  ;;  %v763_v45 = vpop.permute.xlu1 %762 }
 0x368   : > { %v769_v41 = vmul.f32 %v763_v45, %v2051_v57  ;;  %v770_v3 = vmul.f32 %v763_v45, %v2063_v1  ;;  %v771_v47 = vmul.f32 %v763_v45, %v2114_v28  ;;  %v772_v62 = vmul.f32 %v763_v45, %v2092_v18 }
 0x369   : > { %v872_v18 = vsub.s32 3, %v1850_v21  ;;  %v930_v35 = vrot.slane %v1858_v27, %v929_v15  ;;  %v934_v49 = vrot.slane %v1864_v32, %v929_v15  ;;  %v938_v53 = vrot.slane %v1877_v40, %v929_v15 }
 0x36a   : > { %v2204_v48 = vadd.f32 %v770_v3, %v754_v11  ;;  %v2206_v51 = vadd.f32 %v769_v41, %v753_v44  ;;  %v2208_v9 = vadd.f32 %v771_v47, %v755_v29  ;;  %v2210_v17 = vadd.f32 %v772_v62, %v756_v39  ;;  %916 = vrot.lane.b32.xlu0 %v844_v52, %s1622_s27 }
 0x36b   : > { %v873_v37 = vrot.slane %v1858_v27, %v872_v18  ;;  %v877_v4 = vrot.slane %v1864_v32, %v872_v18  ;;  %v881_v21 = vrot.slane %v1877_v40, %v872_v18  ;;  %v885_v56 = vrot.slane %v1893_v46, %v872_v18 }
 0x36c   : > { %v942_v32 = vrot.slane %v1893_v46, %v929_v15 }
 0x3b4   : > { %v846_v30 = vpop.permute.xlu1 %845 }
 0x3b8   : > { %v850_v57 = vpop.permute.xlu1 %849 }
 0x3b9   : > { %v866_v60 = vsel %vm861_vm3, %v846_v30, %v850_v57 }
 0x3ba   : > { %v887_v5 = vmul.f32 %v877_v4, %v866_v60 }
 0x3bc   : > { %v895_v26 = vadd.f32 %v887_v5, %v774_v54 }
 0x3c0   : > { %v848_v42 = vpop.permute.xlu0 %847 }
 0x3c2   : > { %v858_v1 = vpop.permute.xlu1 %857 }
 0x3c3   : > { %v868_v22 = vsel %vm861_vm3, %v858_v1, %v846_v30 }
 0x3c4   : > { %v852_v24 = vpop.permute.xlu0 %851  ;;  %v886_v13 = vmul.f32 %v873_v37, %v868_v22 }
 0x3c5   : > { %v867_v2 = vsel %vm861_vm3, %v848_v42, %v852_v24 }
 0x3c6   : > { %v854_v28 = vpop.permute.xlu1 %853  ;;  %v894_v58 = vadd.f32 %v886_v13, %v773_v10  ;;  %v891_v63 = vmul.f32 %v877_v4, %v867_v2  ;;  %v1623_v2 = vmov 19  }
 0x3c7   : > { %v864_v55 = vsel %vm861_vm3, %v850_v57, %v854_v28  ;;  %v862_v50 = vsel %vm861_vm3, %v854_v28, %v858_v1  ;;  %1493 = vset.pattern.permute.xlu1 %v1623_v2 }
 0x3c8   : > { %v860_v25 = vpop.permute.xlu0 %859  ;;  %v888_v38 = vmul.f32 %v881_v21, %v864_v55  ;;  %v889_v59 = vmul.f32 %v885_v56, %v862_v50  ;;  %v899_v1 = vadd.f32 %v891_v63, %v2204_v48 }
 0x3c9   : > { %v869_v36 = vsel %vm861_vm3, %v860_v25, %v848_v42 }
 0x3ca   : > { %v903_v16 = vpop.permute.xlu1 %902  ;;  %v896_v40 = vadd.f32 %v888_v38, %v2190_v20  ;;  %v897_v54 = vadd.f32 %v889_v59, %v2192_v33  ;;  %v890_v11 = vmul.f32 %v873_v37, %v869_v36 }
 0x3cc   : > { %v856_v31 = vpop.permute.xlu0 %855 }
 0x3cd   : > { %v865_v39 = vsel %vm861_vm3, %v852_v24, %v856_v31  ;;  %v863_v3 = vsel %vm861_vm3, %v856_v31, %v860_v25  ;;  %v898_v24 = vadd.f32 %v890_v11, %v2206_v51 }
 0x3ce   : > { %v907_v23 = vpop.permute.xlu1 %906  ;;  %v892_v28 = vmul.f32 %v881_v21, %v865_v39  ;;  %v893_v37 = vmul.f32 %v885_v56, %v863_v3 }
 0x3cf   : > { %v923_v14 = vsel %vm918_vm4, %v903_v16, %v907_v23 }
 0x3d0   : > { %v943_v43 = vmul.f32 %v930_v35, %v923_v14  ;;  %v905_v27 = vpop.permute.xlu0 %904  ;;  %v901_v5 = vadd.f32 %v893_v37, %v2210_v17 }
 0x3d2   : > { %v911_v19 = vpop.permute.xlu1 %910  ;;  %v2241_v0 = vadd.f32 %v943_v43, %v894_v58 }
 0x3d3   : > { %v921_v12 = vsel %vm918_vm4, %v907_v23, %v911_v19  ;;  %v900_v23 = vadd.f32 %v892_v28, %v2208_v9 }
 0x3d4   : > { %v944_v6 = vmul.f32 %v934_v49, %v921_v12  ;;  %v909_v61 = vpop.permute.xlu0 %908  ;;  %v969_v62 = vmul.f32 %v2241_v0, %v2241_v0 }
 0x3d5   : > { %v924_v8 = vsel %vm918_vm4, %v905_v27, %v909_v61 }
 0x3d6   : > { %v2244_v10 = vadd.f32 %v944_v6, %v895_v26  ;;  %v915_v44 = vpop.permute.xlu1 %914  ;;  %v947_v47 = vmul.f32 %v930_v35, %v924_v8 }
 0x3d7   : > { %v919_v29 = vsel %vm918_vm4, %v911_v19, %v915_v44  ;;  %v925_v46 = vsel %vm918_vm4, %v915_v44, %v903_v16 }
 0x3d8   : > { %v945_v45 = vmul.f32 %v938_v53, %v919_v29  ;;  %v946_v20 = vmul.f32 %v942_v32, %v925_v46  ;;  %v970_v41 = vmul.f32 %v2244_v10, %v2244_v10  ;;  %v913_v33 = vpop.permute.xlu0 %912  ;;  %v959_v42 = vadd.f32 %v2244_v10, %v2241_v0 }
 0x3d9   : > { %v922_v57 = vsel %vm918_vm4, %v909_v61, %v913_v33  ;;  %v2274_v4 = vadd.f32 %v947_v47, %v898_v24  ;;  %v1624_v46 = vmov 20  }
 0x3da   : > { %v2261_v52 = vadd.f32 %v945_v45, %v896_v40  ;;  %v2263_v30 = vadd.f32 %v946_v20, %v897_v54  ;;  %v948_v18 = vmul.f32 %v934_v49, %v922_v57  ;;  %v977_v16 = vadd.f32 %v970_v41, %v969_v62  ;;  %1495 = vset.pattern.permute.xlu0 %v1624_v46  ;;  %v1504_v41 = vld [vmem:[%s1755_s12] sm:$0xff]  ;;  %v1505_v62 = vld [vmem:[%s1755_s12 + $0x8] sm:$0xff] }
 0x3db   : > { %v973_v49 = vmul.f32 %v2274_v4, %v2274_v4 }
 0x3dc   : > { %v960_v25 = vadd.f32 %v959_v42, %v2261_v52  ;;  %v971_v15 = vmul.f32 %v2261_v52, %v2261_v52  ;;  %v2276_v22 = vadd.f32 %v948_v18, %v899_v1  ;;  %v917_v60 = vpop.permute.xlu0 %916  ;;  %v972_v31 = vmul.f32 %v2263_v30, %v2263_v30 }
 0x3dd   : > { %v920_v48 = vsel %vm918_vm4, %v913_v33, %v917_v60  ;;  %v926_v51 = vsel %vm918_vm4, %v917_v60, %v905_v27 }
 0x3de   : > { %v961_v35 = vadd.f32 %v960_v25, %v2263_v30  ;;  %v978_v21 = vadd.f32 %v977_v16, %v971_v15  ;;  %v949_v13 = vmul.f32 %v938_v53, %v920_v48  ;;  %v950_v56 = vmul.f32 %v942_v32, %v926_v51 }
 0x3df   : > { %v974_v55 = vmul.f32 %v2276_v22, %v2276_v22  ;;  %v964_v34 = vadd.f32 %v2276_v22, %v2274_v4 }
 0x3e0   : > { %962 = vadd.xlane.f32.xlu1 %v961_v35  ;;  %v979_v14 = vadd.f32 %v978_v21, %v972_v31  ;;  %v2289_v50 = vadd.f32 %v949_v13, %v900_v23  ;;  %v2295_v43 = vadd.f32 %v950_v56, %v901_v5 }
 0x3e1   : > { %v982_v38 = vadd.f32 %v974_v55, %v973_v49 }
 0x3e2   : > { %980 = vadd.xlane.f32.xlu0 %v979_v14  ;;  %v965_v9 = vadd.f32 %v964_v34, %v2289_v50  ;;  %v975_v27 = vmul.f32 %v2289_v50, %v2289_v50  ;;  %v976_v53 = vmul.f32 %v2295_v43, %v2295_v43 }
 0x3e4   : > { %v966_v19 = vadd.f32 %v965_v9, %v2295_v43  ;;  %v983_v17 = vadd.f32 %v982_v38, %v975_v27 }
 0x3e6   : > { %967 = vadd.xlane.f32.xlu0 %v966_v19  ;;  %v984_v58 = vadd.f32 %v983_v17, %v976_v53 }
 0x3ea   : > { %985 = vadd.xlane.f32.xlu0 %v984_v58 }
 0x46d   : > { %v963_v59 = vpop.xlane.xlu1 %962 }
 0x46e   : > { %v987_v12 = vmul.f32 0.0025510204, %v963_v59 }
 0x46f   : > { %v981_v26 = vpop.xlane.xlu0 %980 }
 0x470   : > { %v991_v36 = vmul.f32 %v987_v12, %v987_v12  ;;  %v989_v6 = vmul.f32 0.0025510204, %v981_v26 }
 0x472   : > { %v993_v32 = vsub.f32 %v989_v6, %v991_v36 }
 0x473   : > { %v968_v63 = vpop.xlane.xlu0 %967 }
 0x474   : > { %v995_v61 = vmax.f32 %v993_v32, 0.0  ;;  %v988_v40 = vmul.f32 0.0025510204, %v968_v63  ;;  %v2399_v32 = vld [vmem:[#allocation12_spill] sm:$0xff]  ;;  %v2400_v63 = vld [vmem:[#allocation14_spill] sm:$0xff] }
 0x476   : > { %v997_v8 = vadd.f32 1e-05, %v995_v61  ;;  %v992_v54 = vmul.f32 %v988_v40, %v988_v40 }
 0x477   : > { %v986_v44 = vpop.xlane.xlu0 %985 }
 0x478   : > { %1500 = vrsqrt.f32 %v997_v8  ;;  %v990_v11 = vmul.f32 0.0025510204, %v986_v44 }
 0x47a   : > { %v994_v29 = vsub.f32 %v990_v11, %v992_v54 }
 0x47c   : > { %v996_v39 = vmax.f32 %v994_v29, 0.0 }
 0x47e   : > { %v998_v45 = vadd.f32 1e-05, %v996_v39 }
 0x480   : > { %1502 = vrsqrt.f32 %v998_v45 }
 0x482   : > { %v1501_v20 = vpop.eup %1500 }
 0x483   : > { %v1001_v3 = vmul.f32 %v1504_v41, %v1501_v20  ;;  %v1075_v20 = vld [vmem:[%s217_s9] sm:$0xff] }
 0x485   : > { %v1003_v47 = vmul.f32 %v1001_v3, %v987_v12 }
 0x487   : > { %1007 = vrot.lane.b32.xlu1 %v1003_v47, %s1610_s25 }
 0x48a   : > { %v1503_v33 = vpop.eup %1502 }
 0x48b   : > { %1017 = vperm.xlu1 %1493, %v1001_v3   ;;  %v1002_v57 = vmul.f32 %v1505_v62, %v1503_v33 }
 0x48d   : > { %v1004_v42 = vmul.f32 %v1002_v57, %v988_v40 }
 0x48f   : > { %1022 = vperm.xlu1 %1493, %v1002_v57   ;;  %1009 = vrot.lane.b32.xlu0 %v1004_v42, %s1610_s25 }
 0x493   : > { %1494 = vset.pattern.permute.xlu1 %v1624_v46 }
 0x4f9   : > { %v1008_v1 = vpop.permute.xlu1 %1007 }
 0x4fa   : > { %v1013_v24 = vsub.f32 %v1504_v41, %v1008_v1 }
 0x4fc   : > { %1035 = vperm.xlu1 %1494, %v1013_v24  }
 0x501   : > { %v1010_v28 = vpop.permute.xlu0 %1009 }
 0x502   : > { %v1014_v18 = vsub.f32 %v1505_v62, %v1010_v28 }
 0x504   : > { %1040 = vperm.xlu0 %1495, %v1014_v18  }
 0x50a   : > { %v1018_v25 = vpop.permute.xlu1 %1017 }
 0x50b   : > { %v1025_v37 = vmul.f32 %v1018_v25, %v2241_v0  ;;  %v1026_v60 = vmul.f32 %v1018_v25, %v2244_v10  ;;  %v1027_v31 = vmul.f32 %v1018_v25, %v2261_v52  ;;  %v1028_v48 = vmul.f32 %v1018_v25, %v2263_v30 }
 0x50e   : > { %v1023_v15 = vpop.permute.xlu1 %1022 }
 0x50f   : > { %v1029_v5 = vmul.f32 %v1023_v15, %v2274_v4  ;;  %v1030_v34 = vmul.f32 %v1023_v15, %v2276_v22  ;;  %v1031_v0 = vmul.f32 %v1023_v15, %v2289_v50  ;;  %v1032_v10 = vmul.f32 %v1023_v15, %v2295_v43  ;;  %v2398_v43 = vld [vmem:[#allocation13_spill] sm:$0xff] }
 0x57b   : > { %v1036_v16 = vpop.permute.xlu1 %1035 }
 0x57c   : > { %v1043_v51 = vadd.f32 %v1036_v16, %v1025_v37  ;;  %v1044_v35 = vadd.f32 %v1036_v16, %v1026_v60  ;;  %v1045_v21 = vadd.f32 %v1036_v16, %v1027_v31  ;;  %v1046_v23 = vadd.f32 %v1036_v16, %v1028_v48 }
 0x57e   : > { %v1051_v13 = vmax.f32 %v1043_v51, 0.0  ;;  %v1052_v56 = vmax.f32 %v1044_v35, 0.0  ;;  %v1053_v55 = vmax.f32 %v1045_v21, 0.0  ;;  %v1054_v14 = vmax.f32 %v1046_v23, 0.0 }
 0x580   : > { %v1059_v38 = vmin.f32 %v1051_v13, 6.0  ;;  %v1060_v19 = vmin.f32 %v1052_v56, 6.0  ;;  %v1061_v17 = vmin.f32 %v1053_v55, 6.0  ;;  %v1062_v53 = vmin.f32 %v1054_v14, 6.0 }
 0x582   : > { %v1067_v50 = vmul.f32 %v1059_v38, %v1867_v7  ;;  %v1069_v6 = vmul.f32 %v1061_v17, %v2398_v43  ;;  %v1068_v61 = vmul.f32 %v1060_v19, %v2399_v32  ;;  %v1070_v40 = vmul.f32 %v1062_v53, %v2400_v63 }
 0x583   : > { %v1041_v49 = vpop.permute.xlu0 %1040 }
 0x584   : > { %v1047_v52 = vadd.f32 %v1041_v49, %v1029_v5  ;;  %v1048_v9 = vadd.f32 %v1041_v49, %v1030_v34  ;;  %v1049_v30 = vadd.f32 %v1041_v49, %v1031_v0  ;;  %v1050_v27 = vadd.f32 %v1041_v49, %v1032_v10 }
 0x586   : > { %v1055_v58 = vmax.f32 %v1047_v52, 0.0  ;;  %v1056_v2 = vmax.f32 %v1048_v9, 0.0  ;;  %v1057_v59 = vmax.f32 %v1049_v30, 0.0  ;;  %v1058_v12 = vmax.f32 %v1050_v27, 0.0 }
 0x588   : > { %v1063_v4 = vmin.f32 %v1055_v58, 6.0  ;;  %v1064_v26 = vmin.f32 %v1056_v2, 6.0  ;;  %v1065_v22 = vmin.f32 %v1057_v59, 6.0  ;;  %v1066_v36 = vmin.f32 %v1058_v12, 6.0 }
 0x58a   : > { %v1071_v8 = vmul.f32 %v1063_v4, %v1867_v7  ;;  %v1073_v44 = vmul.f32 %v1065_v22, %v2398_v43  ;;  %v1072_v54 = vmul.f32 %v1064_v26, %v2399_v32  ;;  %v1074_v11 = vmul.f32 %v1066_v36, %v2400_v63 }
 0x58c   : > { %v1400_v29 = vpack.c.bf16 %v1072_v54, %v1068_v61  ;;  %v1404_v46 = vpack.c.bf16 %v1074_v11, %v1070_v40  ;;  %v1402_v39 = vpack.c.bf16 %v1071_v8, %v1067_v50  ;;  %v1406_v45 = vpack.c.bf16 %v1073_v44, %v1069_v6 }
 0x58e   : > { %1401 = vmatprep.subr.bf16.mxu0 %v1400_v29  ;;  %1405 = vmatprep.subr.bf16.mxu1 %v1404_v46 }
 0x58f   : > { %1403 = vmatpush1.bf16.msra.mxu0 %v1402_v39  ;;  %1407 = vmatpush1.bf16.msra.mxu1 %v1406_v45 }
 0x592   : > { %1391 = vmatmul.mubr.msk.f32.vlgmr.msra.gmra.mrb[4].mxu0 %vm1076_vm5, %v1075_v20  ;;  %1392 = vmatmul.mubr.msk.f32.vlgmr.msra.gmra.mrb[4].mxu1 %vm1076_vm5, %v1075_v20 }
 0x660   : > { %1225 = sbr.rel (%p1393_p7) target bundleno = 1640 (0x668), region = 48 }
 0x665   : > { %v1146_v7 = vpop.f32.mrb[4].mxu0  ;;  %v1217_v41 = vpop.f32.mrb[4].mxu1 }
 0x666   : > { %v1148_v3 = vpop.f32.mrb[5].mxu0  ;;  %v1219_v47 = vpop.f32.mrb[5].mxu1  ;;  %1226 = vst [vmem:[#allocation5] sm:$0xff] (!%p1393_p7), %v1146_v7  ;;  %1228 = vst [vmem:[#allocation5 + $0x10] sm:$0xff] (!%p1393_p7), %v1217_v41 }
 0x667   : > { %1227 = vst [vmem:[#allocation5 + $0x8] sm:$0xff] %v1148_v3  ;;  %1229 = vst [vmem:[#allocation5 + $0x18] sm:$0xff] %v1219_v47 }
 0x668 PF: > { %p1394_p9 = scmp.le.s32.totalorder %s1678_s22, 0 }
 0x66a   : > { %1233 = sbr.rel (%p1394_p9) target bundleno = 1651 (0x673), region = 52 }
 0x66e   : > { %v1234_v33 = vld [vmem:[#allocation5] sm:$0xff] (!%p1394_p9)  ;;  %v1235_v62 = vld [vmem:[#allocation5 + $0x8] sm:$0xff] (!%p1394_p9)  ;;  %v1236_v57 = vld [vmem:[#allocation5 + $0x10] sm:$0xff] (!%p1394_p9) }
 0x66f   : > { %v1238_v42 = vadd.f32 (!%p1394_p9), %v1234_v33, %v1146_v7  ;;  %v1239_v1 = vadd.f32 (!%p1394_p9), %v1235_v62, %v1148_v3  ;;  %v1240_v24 = vadd.f32 (!%p1394_p9), %v1236_v57, %v1217_v41  ;;  %v1237_v28 = vld [vmem:[#allocation5 + $0x18] sm:$0xff] (!%p1394_p9) }
 0x670   : > { %v1241_v18 = vadd.f32 (!%p1394_p9), %v1237_v28, %v1219_v47 }
 0x671   : > { %1242 = vst [vmem:[#allocation5] sm:$0xff] %v1238_v42  ;;  %1243 = vst [vmem:[#allocation5 + $0x8] sm:$0xff] %v1239_v1 }
 0x672   : > { %1244 = vst [vmem:[#allocation5 + $0x10] sm:$0xff] %v1240_v24  ;;  %1245 = vst [vmem:[#allocation5 + $0x18] sm:$0xff] %v1241_v18 }
 0x673 PF: > { %p1395_p10 = scmp.ne.s32.totalorder %s1678_s22, 1 }
 0x674   : > { %v1625_v14 = vmov (!%p1395_p10), 0   ;;  %v1626_v27 = vmov (!%p1395_p10), 1   ;;  %v1250_v38 = vld [vmem:[%s2374_s3] sm:$0xff] (!%p1395_p10)  ;;  %s1627_s12 = smov (!%p1395_p10), 1   ;;  %v2401_v61 = vld [vmem:[#allocation9_spill] sm:$0xff] (!%p1395_p10)  ;;  %v2402_v40 = vld [vmem:[#allocation8_spill] sm:$0xff] (!%p1395_p10) }
 0x675   : > { %1249 = sbr.rel (%p1395_p10) target bundleno = 2085 (0x825), region = 56  ;;  %1506 = vset.pattern.permute.xlu1 (!%p1395_p10), %v1625_v14  ;;  %1507 = vset.pattern.permute.xlu0 (!%p1395_p10), %v1626_v27  ;;  %v2403_v44 = vld [vmem:[#allocation11_spill] sm:$0xff] (!%p1395_p10)  ;;  %v2404_v11 = vld [vmem:[#allocation10_spill] sm:$0xff] (!%p1395_p10) }
 0x679   : > { %v1253_v16 = vld [vmem:[#allocation5 + $0x10] sm:$0xff] (!%p1395_p10)  ;;  %v1254_v51 = vld [vmem:[#allocation5 + $0x18] sm:$0xff] (!%p1395_p10) }
 0x67a   : > { %v1251_v25 = vld [vmem:[#allocation5] sm:$0xff] (!%p1395_p10)  ;;  %v1252_v15 = vld [vmem:[#allocation5 + $0x8] sm:$0xff] (!%p1395_p10)  ;;  %v1262_v48 = vmul.f32 (!%p1395_p10), %v1253_v16, %v1253_v16  ;;  %v1263_v21 = vmul.f32 (!%p1395_p10), %v1254_v51, %v1254_v51 }
 0x67b   : > { %v1255_v37 = vadd.f32 (!%p1395_p10), %v1252_v15, %v1251_v25  ;;  %v1260_v60 = vmul.f32 (!%p1395_p10), %v1251_v25, %v1251_v25  ;;  %v1261_v31 = vmul.f32 (!%p1395_p10), %v1252_v15, %v1252_v15 }
 0x67d   : > { %v1256_v35 = vadd.f32 %v1255_v37, %v1253_v16  ;;  %v1264_v23 = vadd.f32 %v1261_v31, %v1260_v60 }
 0x67f   : > { %v1257_v13 = vadd.f32 %v1256_v35, %v1254_v51  ;;  %v1265_v56 = vadd.f32 %v1264_v23, %v1262_v48 }
 0x681   : > { %1258 = vadd.xlane.f32.xlu0 %v1257_v13  ;;  %v1266_v55 = vadd.f32 %v1265_v56, %v1263_v21 }
 0x685   : > { %1267 = vadd.xlane.f32.xlu0 %v1266_v55 }
 0x70e   : > { %v1259_v5 = vpop.xlane.xlu0 %1258 }
 0x70f   : > { %v1269_v34 = vmul.f32 0.0025510204, %v1259_v5 }
 0x711   : > { %v1271_v10 = vmul.f32 %v1269_v34, %v1269_v34 }
 0x712   : > { %v1268_v0 = vpop.xlane.xlu0 %1267 }
 0x713   : > { %v1270_v49 = vmul.f32 0.0025510204, %v1268_v0 }
 0x715   : > { %v1272_v52 = vsub.f32 %v1270_v49, %v1271_v10 }
 0x717   : > { %v1273_v9 = vmax.f32 %v1272_v52, 0.0 }
 0x719   : > { %v1274_v30 = vadd.f32 1e-05, %v1273_v9 }
 0x71b   : > { %1508 = vrsqrt.f32 %v1274_v30 }
 0x725   : > { %v1509_v19 = vpop.eup %1508 }
 0x726   : > { %v1276_v17 = vmul.f32 %v1509_v19, %v1250_v38 }
 0x728   : > { %v1277_v53 = vmul.f32 %v1276_v17, %v1269_v34 }
 0x72a   : > { %1279 = vrot.lane.b32.xlu1 %v1277_v53, %s1627_s12 }
 0x72e   : > { %1285 = vperm.xlu1 %1506, %v1276_v17  }
 0x79c   : > { %v1280_v58 = vpop.permute.xlu1 %1279 }
 0x79d   : > { %v1282_v2 = vsub.f32 %v1250_v38, %v1280_v58 }
 0x79f   : > { %1294 = vperm.xlu0 %1507, %v1282_v2  }
 0x7ad   : > { %v1286_v59 = vpop.permute.xlu1 %1285 }
 0x7ae   : > { %v1288_v12 = vmul.f32 %v1286_v59, %v1251_v25  ;;  %v1289_v4 = vmul.f32 %v1286_v59, %v1252_v15  ;;  %v1290_v26 = vmul.f32 %v1286_v59, %v1253_v16  ;;  %v1291_v22 = vmul.f32 %v1286_v59, %v1254_v51 }
 0x81e   : > { %v1295_v36 = vpop.permute.xlu0 %1294 }
 0x81f   : > { %v1297_v50 = vadd.f32 %v1295_v36, %v1288_v12  ;;  %v1298_v43 = vadd.f32 %v1295_v36, %v1289_v4  ;;  %v1299_v6 = vadd.f32 %v1295_v36, %v1290_v26  ;;  %v1300_v32 = vadd.f32 %v1295_v36, %v1291_v22 }
 0x821   : > { %v1301_v63 = vadd.f32 %v1297_v50, %v2401_v61  ;;  %v1302_v8 = vadd.f32 %v1298_v43, %v2402_v40  ;;  %v1303_v54 = vadd.f32 %v1299_v6, %v2403_v44  ;;  %v1304_v29 = vadd.f32 %v1300_v32, %v2404_v11 }
 0x823   : > { %1305 = vst [vmem:[#allocation5] sm:$0xff] %v1301_v63  ;;  %1306 = vst [vmem:[#allocation5 + $0x8] sm:$0xff] %v1302_v8 }
 0x824   : > { %1307 = vst [vmem:[#allocation5 + $0x10] sm:$0xff] %v1303_v54  ;;  %1308 = vst [vmem:[#allocation5 + $0x18] sm:$0xff] %v1304_v29 }
 0x825 PF: > { %p1419_p5 = scmp.eq.s32.totalorder %s1678_s22, 1  ;;  %s1628_s15 = smov [#allocation5]  }
 0x826   : > { %s1316_s16 = sshll.u32 %s1628_s15, 4  ;;  %s1317_s16 = int_to_ptr.vmem [resolvable:$true] %s1316_s16 }
 0x827   : > { %s1540_s17 = scalar_lea.vmem %s1317_s16, 512  ;;  %p1547_p1 = scmp.lt.s32.totalorder %s1317_s16, %s1317_s16 }
 0x828   : > { %p1541_p6 = scmp.ne.s32.totalorder %s1317_s16, %s1540_s17  ;;  %p1548_p2 = scmp.lt.s32.totalorder %s1540_s17, %s1540_s17 }
 0x82a   : > { %p1542_p11 = pnand %p1541_p6, %p1419_p5  ;;  %p1549_p3 = por %p1548_p2, %p1547_p1 }
 0x82c   : > { %p1543_p13 = pneg %p1542_p11 }
 0x82e   : > { %p1550_p0 = pnand %p1549_p3, %p1543_p13 }
 0x830   : > { %1553 = shalt.err (!%p1550_p0)
}
 0x831   : > { %s1554_s25 = scalar_lea.hbm %s2376_s5, 512 }
 0x832   : > { %p1555_p4 = scmp.ne.s32.totalorder %s2376_s5, %s1554_s25  ;;  %p1560_p7 = scmp.lt.u32.totalorder %s1554_s25, %s2376_s5 }
 0x834   : > { %p1556_p12 = pnand %p1555_p4, %p1419_p5 }
 0x836   : > { %p1557_p8 = pneg %p1556_p12 }
 0x838   : > { %p1562_p9 = pnand %p1560_p7, %p1557_p8 }
 0x83a   : > { %1565 = shalt.err (!%p1562_p9)
}
 0x83b   : > { %1411 = dma.vmem_to_hbm [thread:$0]  (%p1419_p5), %s1317_s16, 512, %s2376_s5, [#allocation4]  }
 0x83c   : > { %1587 = dma.done.wait (%p1419_p5), [#allocation4], 512  }
 0x83d   : > { %1589 = vsyncadd (%p1419_p5), [#allocation4], 4294966784 }
 0x83e PF: > { %p16_p10 = scmp.ge.s32.totalorder %s1681_s23, 4   ;;  %s2405_s18 = smov %s1596_s19 }
 0x83f   : > { %s2406_s19 = smov %s1600_s20  ;;  %s2407_s20 = smov %s1691_s26 }
 0x840   : > { %s2408_s21 = smov %s1681_s23  ;;  %18 = sbr.rel (!%p16_p10) target bundleno = 4 (0x4), region = 92 }
 0x847   :  { %1329 = vsyncpa [#allocation3], 1 }
 0x848   :  { %1331 = vsyncpa [#allocation3 + $0x1], 1 }
 0x849   :  { %1332 = vsyncpa [#allocation4], 1 }
 0x84a   :  { %1334 = vsyncpa [#allocation4 + $0x1], 1 }

</bundles_post_ra>
